<compile_context>
chip_gen: v7x
topology: tpu7x:2x2x1
jax: 0.10.0
libtpu: 0.0.40
codegen_flags: <defaults>
</compile_context>

<pallas_src>
import functools

import jax
import jax.numpy as jnp
from jax.experimental import pallas as pl
from jax.experimental.pallas import tpu as pltpu


def _attention_math(q_ref, k_ref, v_ref, scale, exact_softmax):
    """Attention math for one batch block: all Bt*H heads processed together."""
    Bt, H, Lq, Dk = q_ref.shape
    Lk = k_ref.shape[-1]
    Dv = v_ref.shape[-1]

    # Fold the softmax scale into q (fewer elements than scores); operands stay
    # in native dtype for the MXU, accumulation is f32.
    q = q_ref[...] * jnp.asarray(scale, dtype=q_ref.dtype)   # [Bt, H, Lq, Dk]
    k = k_ref[...]                                            # [Bt, H, Dk, Lk]
    v = v_ref[...]                                            # [Bt, H, Lk, Dv]

    # Collapse (Bt, H) into a single leading batch dim (leading-dim-only
    # reshape: free, no vreg relayout) so all matmuls issue back-to-back.
    q = q.reshape(Bt * H, Lq, Dk)
    k = k.reshape(Bt * H, Dk, Lk)
    v = v.reshape(Bt * H, Lk, Dv)

    # scores = (q * scale) @ k -- f32 accumulation on the MXU.
    scores = jnp.einsum("nqd,ndk->nqk", q, k,
                        preferred_element_type=jnp.float32)   # [N, Lq, Lk] f32

    # Numerically stable softmax over the key axis (f32 intermediates).
    m = jnp.max(scores, axis=-1, keepdims=True)
    e = jnp.exp(scores - m)
    s = jnp.sum(e, axis=-1, keepdims=True)
    if exact_softmax:
        attn = e / s                                          # rows sum to 1 exactly
    else:
        attn = e * pl.reciprocal(s, approx=True)              # EUP slot, ~1e-3 rel err

    # output = attn @ v -- f32 accumulation on the MXU.
    out = jnp.einsum("nqk,nkd->nqd", attn.astype(v.dtype), v,
                     preferred_element_type=jnp.float32)      # [N, Lq, Dv] f32

    # Split the leading batch dim back out (free, leading-dims-only reshape).
    return out.reshape(Bt, H, Lq, Dv), attn.reshape(Bt, H, Lq, Lk)


def _store_lane_packed(dst_ref, x4):
    """Store x4 [Bt, A, R, C] into dst_ref [Bt, A*R*C] in row-major (a, r, c)
    lane order.

    Uses only leading-dim integer indexing, static 2-D slices and static
    sub-row ref stores: no lane-merging reshape and no unaligned concatenate,
    so it lowers robustly while keeping the HBM-side output slab lane-dense.
    """
    Bt, A, R, C = x4.shape
    x4 = x4.astype(dst_ref.dtype)
    for b in range(Bt):
        for a in range(A):
            tile = x4[b, a]                                   # [R, C] (leading-dim slice)
            for r in range(R):
                off = (a * R + r) * C
                dst_ref[b:b + 1, off:off + C] = tile[r:r + 1, :]


def _sdpa_kernel(q_ref, k_ref, v_ref, out_ref, attn_ref, *, scale):
    # Exact softmax division on this path: the returned attention weights may
    # be reused downstream (res_attention-style), so keep rows summing to 1.
    out4, attn4 = _attention_math(q_ref, k_ref, v_ref, scale, exact_softmax=True)
    _store_lane_packed(out_ref, out4)
    _store_lane_packed(attn_ref, attn4)


def _sdpa_out_only_kernel(q_ref, k_ref, v_ref, out_ref, *, scale):
    out4, _ = _attention_math(q_ref, k_ref, v_ref, scale, exact_softmax=False)
    _store_lane_packed(out_ref, out4)


def _default_batch_block(B):
    """Batch elements per grid step.

    Single-TC chips (v5e/v6e): one grid step for the whole batch (serial grid
    steps only add ~0.35us/step of pipeline overhead).  Dual-TC v7x: two
    parallel steps so both TensorCores get work.
    """
    try:
        kind = jax.devices()[0].device_kind.lower()
    except Exception:  # pragma: no cover - defensive
        kind = ""
    dual_tc = "v7" in kind
    if dual_tc and B >= 2 and B % 2 == 0:
        return B // 2
    return B


def scaled_dot_product_attention(q, k, v, *, scale, return_attn=True,
                                 batch_block=None):
    """q: [B,H,Lq,Dk], k: [B,H,Dk,Lk], v: [B,H,Lk,Dv].

    Returns (output [B,H,Lq,Dv], attn [B,H,Lq,Lk]) if return_attn else output.
    """
    B, H, Lq, Dk = q.shape
    Lk = k.shape[-1]
    Dv = v.shape[-1]

    Bt = batch_block if batch_block is not None else _default_batch_block(B)
    assert B % Bt == 0, "batch_block must divide the batch size"
    steps = B // Bt

    Fo = H * Lq * Dv        # lane-dense flat output width  (256 at test shapes)
    Fa = H * Lq * Lk        # lane-dense flat attn width    (256 at test shapes)

    in_specs = [
        pl.BlockSpec((Bt, H, Lq, Dk), lambda b: (b, 0, 0, 0)),
        pl.BlockSpec((Bt, H, Dk, Lk), lambda b: (b, 0, 0, 0)),
        pl.BlockSpec((Bt, H, Lk, Dv), lambda b: (b, 0, 0, 0)),
    ]

    itemsize = q.dtype.itemsize
    bytes_in = (q.size + k.size + v.size) * itemsize
    flops = 2 * B * H * Lq * Lk * (Dk + Dv)
    transcendentals = B * H * Lq * Lk                          # the exps

    if return_attn:
        kernel = functools.partial(_sdpa_kernel, scale=float(scale))
        out_shape = (
            jax.ShapeDtypeStruct((B, Fo), q.dtype),
            jax.ShapeDtypeStruct((B, Fa), q.dtype),
        )
        out_specs = (
            pl.BlockSpec((Bt, Fo), lambda b: (b, 0)),
            pl.BlockSpec((Bt, Fa), lambda b: (b, 0)),
        )
        bytes_out = (B * Fo + B * Fa) * itemsize
    else:
        kernel = functools.partial(_sdpa_out_only_kernel, scale=float(scale))
        out_shape = jax.ShapeDtypeStruct((B, Fo), q.dtype)
        out_specs = pl.BlockSpec((Bt, Fo), lambda b: (b, 0))
        bytes_out = B * Fo * itemsize

    res = pl.pallas_call(
        kernel,
        out_shape=out_shape,
        grid_spec=pltpu.PrefetchScalarGridSpec(
            num_scalar_prefetch=0,
            grid=(steps,),
            in_specs=in_specs,
            out_specs=out_specs,
        ),
        compiler_params=pltpu.CompilerParams(
            dimension_semantics=("parallel",),
            # Explicit limit: tiny blocks here, but keeps the same tiling safe
            # on v7x (64 MiB physical VMEM) as well as v5e/v6e (128 MiB).
            vmem_limit_bytes=64 * 1024 * 1024,
        ),
        cost_estimate=pl.CostEstimate(
            flops=flops,
            transcendentals=transcendentals,
            bytes_accessed=bytes_in + bytes_out,
        ),
    )(q, k, v)

    # Wrapper-side reshapes back to the module's output layout are free:
    # the flat (h, q, d) / (h, q, k) lane order matches row-major exactly.
    if return_attn:
        out_flat, attn_flat = res
        return (out_flat.reshape(B, H, Lq, Dv),
                attn_flat.reshape(B, H, Lq, Lk))
    return res.reshape(B, H, Lq, Dv)


def _reference(q, k, v, scale):
    scores = jnp.einsum("bhqd,bhdk->bhqk", q, k) * scale
    attn = jax.nn.softmax(scores, axis=-1)
    out = jnp.einsum("bhqk,bhkd->bhqd", attn, v)
    return out, attn


if __name__ == "__main__":
    # Module hyperparameters (deterministic "parameter" init).
    d_model = 32
    n_heads = 4
    head_dim = d_model // n_heads          # d_k = d_v = 8
    scale = head_dim ** (-0.5)             # nn.Parameter init value, lsa=False

    bs = 2
    q_len = 8
    seq_len = 8

    key = jax.random.PRNGKey(0)
    kq, kk, kv = jax.random.split(key, 3)
    q = jax.random.normal(kq, (bs, n_heads, q_len, head_dim), dtype=jnp.float32)
    k = jax.random.normal(kk, (bs, n_heads, head_dim, seq_len), dtype=jnp.float32)
    v = jax.random.normal(kv, (bs, n_heads, seq_len, head_dim), dtype=jnp.float32)

    # Default path (matches the module): returns (output, attn_weights).
    out, attn = scaled_dot_product_attention(q, k, v, scale=scale)
    out = jax.block_until_ready(out)
    attn = jax.block_until_ready(attn)

    # Output-only path (skips the attn HBM writeback, approx reciprocal OK).
    out_only = scaled_dot_product_attention(q, k, v, scale=scale, return_attn=False)
    out_only = jax.block_until_ready(out_only)

    ref_out, ref_attn = _reference(q, k, v, scale)
    # return_attn path uses exact softmax division; out-only path uses the EUP
    # approximate reciprocal -> keep a small tolerance for both.
    assert jnp.allclose(out, ref_out, atol=2e-3, rtol=2e-3)
    assert jnp.allclose(attn, ref_attn, atol=2e-3, rtol=2e-3)
    assert jnp.allclose(out_only, ref_out, atol=2e-3, rtol=2e-3)

    print("KERNEL_OK")
</pallas_src>

<mosaic_0001>
module attributes {stable_mosaic.version = 11 : i64} {
  func.func @_sdpa_kernel(%arg0: i32, %arg1: memref<2x4x8x8xf32, #tpu.memory_space<vmem>>, %arg2: memref<2x4x8x8xf32, #tpu.memory_space<vmem>>, %arg3: memref<2x4x8x8xf32, #tpu.memory_space<vmem>>, %arg4: memref<2x256xf32, #tpu.memory_space<vmem>>, %arg5: memref<2x256xf32, #tpu.memory_space<vmem>>) attributes {dimension_semantics = [#tpu.dimension_semantics<parallel>], iteration_bounds = array<i64: 1>, scalar_prefetch = 0 : i64, scratch_operands = 0 : i64, tpu.core_type = #tpu.core_type<tc>, window_params = [{transform_indices = @transform_0, window_bounds = array<i64: 2, 4, 8, 8>}, {transform_indices = @transform_1, window_bounds = array<i64: 2, 4, 8, 8>}, {transform_indices = @transform_2, window_bounds = array<i64: 2, 4, 8, 8>}, {transform_indices = @transform_3, window_bounds = array<i64: 2, 256>}, {transform_indices = @transform_4, window_bounds = array<i64: 2, 256>}]} {
    %c0 = arith.constant 0 : index
    %c0_0 = arith.constant 0 : index
    %c0_1 = arith.constant 0 : index
    %c0_2 = arith.constant 0 : index
    %0 = vector.load %arg1[%c0, %c0_0, %c0_1, %c0_2] : memref<2x4x8x8xf32, #tpu.memory_space<vmem>>, vector<2x4x8x8xf32>
    %cst = arith.constant 0.353553385 : f32
    %1 = vector.broadcast %cst : f32 to vector<2x4x8x8xf32>
    %2 = arith.mulf %0, %1 : vector<2x4x8x8xf32>
    %c0_3 = arith.constant 0 : index
    %c0_4 = arith.constant 0 : index
    %c0_5 = arith.constant 0 : index
    %c0_6 = arith.constant 0 : index
    %3 = vector.load %arg2[%c0_3, %c0_4, %c0_5, %c0_6] : memref<2x4x8x8xf32, #tpu.memory_space<vmem>>, vector<2x4x8x8xf32>
    %c0_7 = arith.constant 0 : index
    %c0_8 = arith.constant 0 : index
    %c0_9 = arith.constant 0 : index
    %c0_10 = arith.constant 0 : index
    %4 = vector.load %arg3[%c0_7, %c0_8, %c0_9, %c0_10] : memref<2x4x8x8xf32, #tpu.memory_space<vmem>>, vector<2x4x8x8xf32>
    %5 = vector.shape_cast %2 : vector<2x4x8x8xf32> to vector<8x8x8xf32>
    %6 = vector.shape_cast %3 : vector<2x4x8x8xf32> to vector<8x8x8xf32>
    %7 = vector.shape_cast %4 : vector<2x4x8x8xf32> to vector<8x8x8xf32>
    "tpu.trace_start"() <{level = 10 : i32, message = "nqd,ndk->nqk"}> : () -> ()
    %cst_11 = arith.constant dense<0.000000e+00> : vector<8x8x8xf32>
    %8 = tpu.matmul %5, %6, %cst_11 {dimension_numbers = #tpu.dot_dimension_numbers<[2], [1], [1], [2], [0, 0, 0, 1, 1, 2], [0], [0]>} : vector<8x8x8xf32>, vector<8x8x8xf32>, vector<8x8x8xf32> -> vector<8x8x8xf32>
    "tpu.trace_stop"() : () -> ()
    %cst_12 = arith.constant dense<0xFF800000> : vector<8x8xf32>
    %9 = vector.multi_reduction <maximumf>, %8, %cst_12 [2] : vector<8x8x8xf32> to vector<8x8xf32>
    %10 = vector.shape_cast %9 : vector<8x8xf32> to vector<8x8x1xf32>
    %11 = vector.broadcast %10 : vector<8x8x1xf32> to vector<8x8x8xf32>
    %12 = arith.subf %8, %11 : vector<8x8x8xf32>
    %13 = math.exp %12 : vector<8x8x8xf32>
    %cst_13 = arith.constant dense<0.000000e+00> : vector<8x8xf32>
    %14 = vector.multi_reduction <add>, %13, %cst_13 [2] : vector<8x8x8xf32> to vector<8x8xf32>
    %15 = vector.shape_cast %14 : vector<8x8xf32> to vector<8x8x1xf32>
    %16 = vector.broadcast %15 : vector<8x8x1xf32> to vector<8x8x8xf32>
    %17 = arith.divf %13, %16 : vector<8x8x8xf32>
    "tpu.trace_start"() <{level = 10 : i32, message = "nqk,nkd->nqd"}> : () -> ()
    %cst_14 = arith.constant dense<0.000000e+00> : vector<8x8x8xf32>
    %18 = tpu.matmul %17, %7, %cst_14 {dimension_numbers = #tpu.dot_dimension_numbers<[2], [1], [1], [2], [0, 0, 0, 1, 1, 2], [0], [0]>} : vector<8x8x8xf32>, vector<8x8x8xf32>, vector<8x8x8xf32> -> vector<8x8x8xf32>
    "tpu.trace_stop"() : () -> ()
    %19 = vector.shape_cast %18 : vector<8x8x8xf32> to vector<2x4x8x8xf32>
    %20 = vector.shape_cast %17 : vector<8x8x8xf32> to vector<2x4x8x8xf32>
    %21 = vector.extract_strided_slice %19 {offsets = [0, 0, 0, 0], sizes = [1, 1, 8, 8], strides = [1, 1, 1, 1]} : vector<2x4x8x8xf32> to vector<1x1x8x8xf32>
    %22 = vector.shape_cast %21 : vector<1x1x8x8xf32> to vector<8x8xf32>
    %23 = vector.extract_strided_slice %22 {offsets = [0, 0], sizes = [1, 8], strides = [1, 1]} : vector<8x8xf32> to vector<1x8xf32>
    %c0_15 = arith.constant 0 : index
    %c0_16 = arith.constant 0 : index
    %24 = vector.load %arg4[%c0_15, %c0_16] : memref<2x256xf32, #tpu.memory_space<vmem>>, vector<1x8xf32>
    tpu.vector_store %arg4[%c0_15, %c0_16], %23 {strides = array<i32>} : memref<2x256xf32, #tpu.memory_space<vmem>>, vector<1x8xf32>,
    %25 = vector.extract_strided_slice %22 {offsets = [1, 0], sizes = [1, 8], strides = [1, 1]} : vector<8x8xf32> to vector<1x8xf32>
    %c0_17 = arith.constant 0 : index
    %c8 = arith.constant 8 : index
    %26 = vector.load %arg4[%c0_17, %c8] : memref<2x256xf32, #tpu.memory_space<vmem>>, vector<1x8xf32>
    tpu.vector_store %arg4[%c0_17, %c8], %25 {strides = array<i32>} : memref<2x256xf32, #tpu.memory_space<vmem>>, vector<1x8xf32>,
    %27 = vector.extract_strided_slice %22 {offsets = [2, 0], sizes = [1, 8], strides = [1, 1]} : vector<8x8xf32> to vector<1x8xf32>
    %c0_18 = arith.constant 0 : index
    %c16 = arith.constant 16 : index
    %28 = vector.load %arg4[%c0_18, %c16] : memref<2x256xf32, #tpu.memory_space<vmem>>, vector<1x8xf32>
    tpu.vector_store %arg4[%c0_18, %c16], %27 {strides = array<i32>} : memref<2x256xf32, #tpu.memory_space<vmem>>, vector<1x8xf32>,
    %29 = vector.extract_strided_slice %22 {offsets = [3, 0], sizes = [1, 8], strides = [1, 1]} : vector<8x8xf32> to vector<1x8xf32>
    %c0_19 = arith.constant 0 : index
    %c24 = arith.constant 24 : index
    %30 = vector.load %arg4[%c0_19, %c24] : memref<2x256xf32, #tpu.memory_space<vmem>>, vector<1x8xf32>
    tpu.vector_store %arg4[%c0_19, %c24], %29 {strides = array<i32>} : memref<2x256xf32, #tpu.memory_space<vmem>>, vector<1x8xf32>,
    %31 = vector.extract_strided_slice %22 {offsets = [4, 0], sizes = [1, 8], strides = [1, 1]} : vector<8x8xf32> to vector<1x8xf32>
    %c0_20 = arith.constant 0 : index
    %c32 = arith.constant 32 : index
    %32 = vector.load %arg4[%c0_20, %c32] : memref<2x256xf32, #tpu.memory_space<vmem>>, vector<1x8xf32>
    tpu.vector_store %arg4[%c0_20, %c32], %31 {strides = array<i32>} : memref<2x256xf32, #tpu.memory_space<vmem>>, vector<1x8xf32>,
    %33 = vector.extract_strided_slice %22 {offsets = [5, 0], sizes = [1, 8], strides = [1, 1]} : vector<8x8xf32> to vector<1x8xf32>
    %c0_21 = arith.constant 0 : index
    %c40 = arith.constant 40 : index
    %34 = vector.load %arg4[%c0_21, %c40] : memref<2x256xf32, #tpu.memory_space<vmem>>, vector<1x8xf32>
    tpu.vector_store %arg4[%c0_21, %c40], %33 {strides = array<i32>} : memref<2x256xf32, #tpu.memory_space<vmem>>, vector<1x8xf32>,
    %35 = vector.extract_strided_slice %22 {offsets = [6, 0], sizes = [1, 8], strides = [1, 1]} : vector<8x8xf32> to vector<1x8xf32>
    %c0_22 = arith.constant 0 : index
    %c48 = arith.constant 48 : index
    %36 = vector.load %arg4[%c0_22, %c48] : memref<2x256xf32, #tpu.memory_space<vmem>>, vector<1x8xf32>
    tpu.vector_store %arg4[%c0_22, %c48], %35 {strides = array<i32>} : memref<2x256xf32, #tpu.memory_space<vmem>>, vector<1x8xf32>,
    %37 = vector.extract_strided_slice %22 {offsets = [7, 0], sizes = [1, 8], strides = [1, 1]} : vector<8x8xf32> to vector<1x8xf32>
    %c0_23 = arith.constant 0 : index
    %c56 = arith.constant 56 : index
    %38 = vector.load %arg4[%c0_23, %c56] : memref<2x256xf32, #tpu.memory_space<vmem>>, vector<1x8xf32>
    tpu.vector_store %arg4[%c0_23, %c56], %37 {strides = array<i32>} : memref<2x256xf32, #tpu.memory_space<vmem>>, vector<1x8xf32>,
    %39 = vector.extract_strided_slice %19 {offsets = [0, 1, 0, 0], sizes = [1, 1, 8, 8], strides = [1, 1, 1, 1]} : vector<2x4x8x8xf32> to vector<1x1x8x8xf32>
    %40 = vector.shape_cast %39 : vector<1x1x8x8xf32> to vector<8x8xf32>
    %41 = vector.extract_strided_slice %40 {offsets = [0, 0], sizes = [1, 8], strides = [1, 1]} : vector<8x8xf32> to vector<1x8xf32>
    %c0_24 = arith.constant 0 : index
    %c64 = arith.constant 64 : index
    %42 = vector.load %arg4[%c0_24, %c64] : memref<2x256xf32, #tpu.memory_space<vmem>>, vector<1x8xf32>
    tpu.vector_store %arg4[%c0_24, %c64], %41 {strides = array<i32>} : memref<2x256xf32, #tpu.memory_space<vmem>>, vector<1x8xf32>,
    %43 = vector.extract_strided_slice %40 {offsets = [1, 0], sizes = [1, 8], strides = [1, 1]} : vector<8x8xf32> to vector<1x8xf32>
    %c0_25 = arith.constant 0 : index
    %c72 = arith.constant 72 : index
    %44 = vector.load %arg4[%c0_25, %c72] : memref<2x256xf32, #tpu.memory_space<vmem>>, vector<1x8xf32>
    tpu.vector_store %arg4[%c0_25, %c72], %43 {strides = array<i32>} : memref<2x256xf32, #tpu.memory_space<vmem>>, vector<1x8xf32>,
    %45 = vector.extract_strided_slice %40 {offsets = [2, 0], sizes = [1, 8], strides = [1, 1]} : vector<8x8xf32> to vector<1x8xf32>
    %c0_26 = arith.constant 0 : index
    %c80 = arith.constant 80 : index
    %46 = vector.load %arg4[%c0_26, %c80] : memref<2x256xf32, #tpu.memory_space<vmem>>, vector<1x8xf32>
    tpu.vector_store %arg4[%c0_26, %c80], %45 {strides = array<i32>} : memref<2x256xf32, #tpu.memory_space<vmem>>, vector<1x8xf32>,
    %47 = vector.extract_strided_slice %40 {offsets = [3, 0], sizes = [1, 8], strides = [1, 1]} : vector<8x8xf32> to vector<1x8xf32>
    %c0_27 = arith.constant 0 : index
    %c88 = arith.constant 88 : index
    %48 = vector.load %arg4[%c0_27, %c88] : memref<2x256xf32, #tpu.memory_space<vmem>>, vector<1x8xf32>
    tpu.vector_store %arg4[%c0_27, %c88], %47 {strides = array<i32>} : memref<2x256xf32, #tpu.memory_space<vmem>>, vector<1x8xf32>,
    %49 = vector.extract_strided_slice %40 {offsets = [4, 0], sizes = [1, 8], strides = [1, 1]} : vector<8x8xf32> to vector<1x8xf32>
    %c0_28 = arith.constant 0 : index
    %c96 = arith.constant 96 : index
    %50 = vector.load %arg4[%c0_28, %c96] : memref<2x256xf32, #tpu.memory_space<vmem>>, vector<1x8xf32>
    tpu.vector_store %arg4[%c0_28, %c96], %49 {strides = array<i32>} : memref<2x256xf32, #tpu.memory_space<vmem>>, vector<1x8xf32>,
    %51 = vector.extract_strided_slice %40 {offsets = [5, 0], sizes = [1, 8], strides = [1, 1]} : vector<8x8xf32> to vector<1x8xf32>
    %c0_29 = arith.constant 0 : index
    %c104 = arith.constant 104 : index
    %52 = vector.load %arg4[%c0_29, %c104] : memref<2x256xf32, #tpu.memory_space<vmem>>, vector<1x8xf32>
    tpu.vector_store %arg4[%c0_29, %c104], %51 {strides = array<i32>} : memref<2x256xf32, #tpu.memory_space<vmem>>, vector<1x8xf32>,
    %53 = vector.extract_strided_slice %40 {offsets = [6, 0], sizes = [1, 8], strides = [1, 1]} : vector<8x8xf32> to vector<1x8xf32>
    %c0_30 = arith.constant 0 : index
    %c112 = arith.constant 112 : index
    %54 = vector.load %arg4[%c0_30, %c112] : memref<2x256xf32, #tpu.memory_space<vmem>>, vector<1x8xf32>
    tpu.vector_store %arg4[%c0_30, %c112], %53 {strides = array<i32>} : memref<2x256xf32, #tpu.memory_space<vmem>>, vector<1x8xf32>,
    %55 = vector.extract_strided_slice %40 {offsets = [7, 0], sizes = [1, 8], strides = [1, 1]} : vector<8x8xf32> to vector<1x8xf32>
    %c0_31 = arith.constant 0 : index
    %c120 = arith.constant 120 : index
    %56 = vector.load %arg4[%c0_31, %c120] : memref<2x256xf32, #tpu.memory_space<vmem>>, vector<1x8xf32>
    tpu.vector_store %arg4[%c0_31, %c120], %55 {strides = array<i32>} : memref<2x256xf32, #tpu.memory_space<vmem>>, vector<1x8xf32>,
    %57 = vector.extract_strided_slice %19 {offsets = [0, 2, 0, 0], sizes = [1, 1, 8, 8], strides = [1, 1, 1, 1]} : vector<2x4x8x8xf32> to vector<1x1x8x8xf32>
    %58 = vector.shape_cast %57 : vector<1x1x8x8xf32> to vector<8x8xf32>
    %59 = vector.extract_strided_slice %58 {offsets = [0, 0], sizes = [1, 8], strides = [1, 1]} : vector<8x8xf32> to vector<1x8xf32>
    %c0_32 = arith.constant 0 : index
    %c128 = arith.constant 128 : index
    %60 = vector.load %arg4[%c0_32, %c128] : memref<2x256xf32, #tpu.memory_space<vmem>>, vector<1x8xf32>
    tpu.vector_store %arg4[%c0_32, %c128], %59 {strides = array<i32>} : memref<2x256xf32, #tpu.memory_space<vmem>>, vector<1x8xf32>,
    %61 = vector.extract_strided_slice %58 {offsets = [1, 0], sizes = [1, 8], strides = [1, 1]} : vector<8x8xf32> to vector<1x8xf32>
    %c0_33 = arith.constant 0 : index
    %c136 = arith.constant 136 : index
    %62 = vector.load %arg4[%c0_33, %c136] : memref<2x256xf32, #tpu.memory_space<vmem>>, vector<1x8xf32>
    tpu.vector_store %arg4[%c0_33, %c136], %61 {strides = array<i32>} : memref<2x256xf32, #tpu.memory_space<vmem>>, vector<1x8xf32>,
    %63 = vector.extract_strided_slice %58 {offsets = [2, 0], sizes = [1, 8], strides = [1, 1]} : vector<8x8xf32> to vector<1x8xf32>
    %c0_34 = arith.constant 0 : index
    %c144 = arith.constant 144 : index
    %64 = vector.load %arg4[%c0_34, %c144] : memref<2x256xf32, #tpu.memory_space<vmem>>, vector<1x8xf32>
    tpu.vector_store %arg4[%c0_34, %c144], %63 {strides = array<i32>} : memref<2x256xf32, #tpu.memory_space<vmem>>, vector<1x8xf32>,
    %65 = vector.extract_strided_slice %58 {offsets = [3, 0], sizes = [1, 8], strides = [1, 1]} : vector<8x8xf32> to vector<1x8xf32>
    %c0_35 = arith.constant 0 : index
    %c152 = arith.constant 152 : index
    %66 = vector.load %arg4[%c0_35, %c152] : memref<2x256xf32, #tpu.memory_space<vmem>>, vector<1x8xf32>
    tpu.vector_store %arg4[%c0_35, %c152], %65 {strides = array<i32>} : memref<2x256xf32, #tpu.memory_space<vmem>>, vector<1x8xf32>,
    %67 = vector.extract_strided_slice %58 {offsets = [4, 0], sizes = [1, 8], strides = [1, 1]} : vector<8x8xf32> to vector<1x8xf32>
    %c0_36 = arith.constant 0 : index
    %c160 = arith.constant 160 : index
    %68 = vector.load %arg4[%c0_36, %c160] : memref<2x256xf32, #tpu.memory_space<vmem>>, vector<1x8xf32>
    tpu.vector_store %arg4[%c0_36, %c160], %67 {strides = array<i32>} : memref<2x256xf32, #tpu.memory_space<vmem>>, vector<1x8xf32>,
    %69 = vector.extract_strided_slice %58 {offsets = [5, 0], sizes = [1, 8], strides = [1, 1]} : vector<8x8xf32> to vector<1x8xf32>
    %c0_37 = arith.constant 0 : index
    %c168 = arith.constant 168 : index
    %70 = vector.load %arg4[%c0_37, %c168] : memref<2x256xf32, #tpu.memory_space<vmem>>, vector<1x8xf32>
    tpu.vector_store %arg4[%c0_37, %c168], %69 {strides = array<i32>} : memref<2x256xf32, #tpu.memory_space<vmem>>, vector<1x8xf32>,
    %71 = vector.extract_strided_slice %58 {offsets = [6, 0], sizes = [1, 8], strides = [1, 1]} : vector<8x8xf32> to vector<1x8xf32>
    %c0_38 = arith.constant 0 : index
    %c176 = arith.constant 176 : index
    %72 = vector.load %arg4[%c0_38, %c176] : memref<2x256xf32, #tpu.memory_space<vmem>>, vector<1x8xf32>
    tpu.vector_store %arg4[%c0_38, %c176], %71 {strides = array<i32>} : memref<2x256xf32, #tpu.memory_space<vmem>>, vector<1x8xf32>,
    %73 = vector.extract_strided_slice %58 {offsets = [7, 0], sizes = [1, 8], strides = [1, 1]} : vector<8x8xf32> to vector<1x8xf32>
    %c0_39 = arith.constant 0 : index
    %c184 = arith.constant 184 : index
    %74 = vector.load %arg4[%c0_39, %c184] : memref<2x256xf32, #tpu.memory_space<vmem>>, vector<1x8xf32>
    tpu.vector_store %arg4[%c0_39, %c184], %73 {strides = array<i32>} : memref<2x256xf32, #tpu.memory_space<vmem>>, vector<1x8xf32>,
    %75 = vector.extract_strided_slice %19 {offsets = [0, 3, 0, 0], sizes = [1, 1, 8, 8], strides = [1, 1, 1, 1]} : vector<2x4x8x8xf32> to vector<1x1x8x8xf32>
    %76 = vector.shape_cast %75 : vector<1x1x8x8xf32> to vector<8x8xf32>
    %77 = vector.extract_strided_slice %76 {offsets = [0, 0], sizes = [1, 8], strides = [1, 1]} : vector<8x8xf32> to vector<1x8xf32>
    %c0_40 = arith.constant 0 : index
    %c192 = arith.constant 192 : index
    %78 = vector.load %arg4[%c0_40, %c192] : memref<2x256xf32, #tpu.memory_space<vmem>>, vector<1x8xf32>
    tpu.vector_store %arg4[%c0_40, %c192], %77 {strides = array<i32>} : memref<2x256xf32, #tpu.memory_space<vmem>>, vector<1x8xf32>,
    %79 = vector.extract_strided_slice %76 {offsets = [1, 0], sizes = [1, 8], strides = [1, 1]} : vector<8x8xf32> to vector<1x8xf32>
    %c0_41 = arith.constant 0 : index
    %c200 = arith.constant 200 : index
    %80 = vector.load %arg4[%c0_41, %c200] : memref<2x256xf32, #tpu.memory_space<vmem>>, vector<1x8xf32>
    tpu.vector_store %arg4[%c0_41, %c200], %79 {strides = array<i32>} : memref<2x256xf32, #tpu.memory_space<vmem>>, vector<1x8xf32>,
    %81 = vector.extract_strided_slice %76 {offsets = [2, 0], sizes = [1, 8], strides = [1, 1]} : vector<8x8xf32> to vector<1x8xf32>
    %c0_42 = arith.constant 0 : index
    %c208 = arith.constant 208 : index
    %82 = vector.load %arg4[%c0_42, %c208] : memref<2x256xf32, #tpu.memory_space<vmem>>, vector<1x8xf32>
    tpu.vector_store %arg4[%c0_42, %c208], %81 {strides = array<i32>} : memref<2x256xf32, #tpu.memory_space<vmem>>, vector<1x8xf32>,
    %83 = vector.extract_strided_slice %76 {offsets = [3, 0], sizes = [1, 8], strides = [1, 1]} : vector<8x8xf32> to vector<1x8xf32>
    %c0_43 = arith.constant 0 : index
    %c216 = arith.constant 216 : index
    %84 = vector.load %arg4[%c0_43, %c216] : memref<2x256xf32, #tpu.memory_space<vmem>>, vector<1x8xf32>
    tpu.vector_store %arg4[%c0_43, %c216], %83 {strides = array<i32>} : memref<2x256xf32, #tpu.memory_space<vmem>>, vector<1x8xf32>,
    %85 = vector.extract_strided_slice %76 {offsets = [4, 0], sizes = [1, 8], strides = [1, 1]} : vector<8x8xf32> to vector<1x8xf32>
    %c0_44 = arith.constant 0 : index
    %c224 = arith.constant 224 : index
    %86 = vector.load %arg4[%c0_44, %c224] : memref<2x256xf32, #tpu.memory_space<vmem>>, vector<1x8xf32>
    tpu.vector_store %arg4[%c0_44, %c224], %85 {strides = array<i32>} : memref<2x256xf32, #tpu.memory_space<vmem>>, vector<1x8xf32>,
    %87 = vector.extract_strided_slice %76 {offsets = [5, 0], sizes = [1, 8], strides = [1, 1]} : vector<8x8xf32> to vector<1x8xf32>
    %c0_45 = arith.constant 0 : index
    %c232 = arith.constant 232 : index
    %88 = vector.load %arg4[%c0_45, %c232] : memref<2x256xf32, #tpu.memory_space<vmem>>, vector<1x8xf32>
    tpu.vector_store %arg4[%c0_45, %c232], %87 {strides = array<i32>} : memref<2x256xf32, #tpu.memory_space<vmem>>, vector<1x8xf32>,
    %89 = vector.extract_strided_slice %76 {offsets = [6, 0], sizes = [1, 8], strides = [1, 1]} : vector<8x8xf32> to vector<1x8xf32>
    %c0_46 = arith.constant 0 : index
    %c240 = arith.constant 240 : index
    %90 = vector.load %arg4[%c0_46, %c240] : memref<2x256xf32, #tpu.memory_space<vmem>>, vector<1x8xf32>
    tpu.vector_store %arg4[%c0_46, %c240], %89 {strides = array<i32>} : memref<2x256xf32, #tpu.memory_space<vmem>>, vector<1x8xf32>,
    %91 = vector.extract_strided_slice %76 {offsets = [7, 0], sizes = [1, 8], strides = [1, 1]} : vector<8x8xf32> to vector<1x8xf32>
    %c0_47 = arith.constant 0 : index
    %c248 = arith.constant 248 : index
    %92 = vector.load %arg4[%c0_47, %c248] : memref<2x256xf32, #tpu.memory_space<vmem>>, vector<1x8xf32>
    tpu.vector_store %arg4[%c0_47, %c248], %91 {strides = array<i32>} : memref<2x256xf32, #tpu.memory_space<vmem>>, vector<1x8xf32>,
    %93 = vector.extract_strided_slice %19 {offsets = [1, 0, 0, 0], sizes = [1, 1, 8, 8], strides = [1, 1, 1, 1]} : vector<2x4x8x8xf32> to vector<1x1x8x8xf32>
    %94 = vector.shape_cast %93 : vector<1x1x8x8xf32> to vector<8x8xf32>
    %95 = vector.extract_strided_slice %94 {offsets = [0, 0], sizes = [1, 8], strides = [1, 1]} : vector<8x8xf32> to vector<1x8xf32>
    %c1 = arith.constant 1 : index
    %c0_48 = arith.constant 0 : index
    %96 = vector.load %arg4[%c1, %c0_48] : memref<2x256xf32, #tpu.memory_space<vmem>>, vector<1x8xf32>
    tpu.vector_store %arg4[%c1, %c0_48], %95 {strides = array<i32>} : memref<2x256xf32, #tpu.memory_space<vmem>>, vector<1x8xf32>,
    %97 = vector.extract_strided_slice %94 {offsets = [1, 0], sizes = [1, 8], strides = [1, 1]} : vector<8x8xf32> to vector<1x8xf32>
    %c1_49 = arith.constant 1 : index
    %c8_50 = arith.constant 8 : index
    %98 = vector.load %arg4[%c1_49, %c8_50] : memref<2x256xf32, #tpu.memory_space<vmem>>, vector<1x8xf32>
    tpu.vector_store %arg4[%c1_49, %c8_50], %97 {strides = array<i32>} : memref<2x256xf32, #tpu.memory_space<vmem>>, vector<1x8xf32>,
    %99 = vector.extract_strided_slice %94 {offsets = [2, 0], sizes = [1, 8], strides = [1, 1]} : vector<8x8xf32> to vector<1x8xf32>
    %c1_51 = arith.constant 1 : index
    %c16_52 = arith.constant 16 : index
    %100 = vector.load %arg4[%c1_51, %c16_52] : memref<2x256xf32, #tpu.memory_space<vmem>>, vector<1x8xf32>
    tpu.vector_store %arg4[%c1_51, %c16_52], %99 {strides = array<i32>} : memref<2x256xf32, #tpu.memory_space<vmem>>, vector<1x8xf32>,
    %101 = vector.extract_strided_slice %94 {offsets = [3, 0], sizes = [1, 8], strides = [1, 1]} : vector<8x8xf32> to vector<1x8xf32>
    %c1_53 = arith.constant 1 : index
    %c24_54 = arith.constant 24 : index
    %102 = vector.load %arg4[%c1_53, %c24_54] : memref<2x256xf32, #tpu.memory_space<vmem>>, vector<1x8xf32>
    tpu.vector_store %arg4[%c1_53, %c24_54], %101 {strides = array<i32>} : memref<2x256xf32, #tpu.memory_space<vmem>>, vector<1x8xf32>,
    %103 = vector.extract_strided_slice %94 {offsets = [4, 0], sizes = [1, 8], strides = [1, 1]} : vector<8x8xf32> to vector<1x8xf32>
    %c1_55 = arith.constant 1 : index
    %c32_56 = arith.constant 32 : index
    %104 = vector.load %arg4[%c1_55, %c32_56] : memref<2x256xf32, #tpu.memory_space<vmem>>, vector<1x8xf32>
    tpu.vector_store %arg4[%c1_55, %c32_56], %103 {strides = array<i32>} : memref<2x256xf32, #tpu.memory_space<vmem>>, vector<1x8xf32>,
    %105 = vector.extract_strided_slice %94 {offsets = [5, 0], sizes = [1, 8], strides = [1, 1]} : vector<8x8xf32> to vector<1x8xf32>
    %c1_57 = arith.constant 1 : index
    %c40_58 = arith.constant 40 : index
    %106 = vector.load %arg4[%c1_57, %c40_58] : memref<2x256xf32, #tpu.memory_space<vmem>>, vector<1x8xf32>
    tpu.vector_store %arg4[%c1_57, %c40_58], %105 {strides = array<i32>} : memref<2x256xf32, #tpu.memory_space<vmem>>, vector<1x8xf32>,
    %107 = vector.extract_strided_slice %94 {offsets = [6, 0], sizes = [1, 8], strides = [1, 1]} : vector<8x8xf32> to vector<1x8xf32>
    %c1_59 = arith.constant 1 : index
    %c48_60 = arith.constant 48 : index
    %108 = vector.load %arg4[%c1_59, %c48_60] : memref<2x256xf32, #tpu.memory_space<vmem>>, vector<1x8xf32>
    tpu.vector_store %arg4[%c1_59, %c48_60], %107 {strides = array<i32>} : memref<2x256xf32, #tpu.memory_space<vmem>>, vector<1x8xf32>,
    %109 = vector.extract_strided_slice %94 {offsets = [7, 0], sizes = [1, 8], strides = [1, 1]} : vector<8x8xf32> to vector<1x8xf32>
    %c1_61 = arith.constant 1 : index
    %c56_62 = arith.constant 56 : index
    %110 = vector.load %arg4[%c1_61, %c56_62] : memref<2x256xf32, #tpu.memory_space<vmem>>, vector<1x8xf32>
    tpu.vector_store %arg4[%c1_61, %c56_62], %109 {strides = array<i32>} : memref<2x256xf32, #tpu.memory_space<vmem>>, vector<1x8xf32>,
    %111 = vector.extract_strided_slice %19 {offsets = [1, 1, 0, 0], sizes = [1, 1, 8, 8], strides = [1, 1, 1, 1]} : vector<2x4x8x8xf32> to vector<1x1x8x8xf32>
    %112 = vector.shape_cast %111 : vector<1x1x8x8xf32> to vector<8x8xf32>
    %113 = vector.extract_strided_slice %112 {offsets = [0, 0], sizes = [1, 8], strides = [1, 1]} : vector<8x8xf32> to vector<1x8xf32>
    %c1_63 = arith.constant 1 : index
    %c64_64 = arith.constant 64 : index
    %114 = vector.load %arg4[%c1_63, %c64_64] : memref<2x256xf32, #tpu.memory_space<vmem>>, vector<1x8xf32>
    tpu.vector_store %arg4[%c1_63, %c64_64], %113 {strides = array<i32>} : memref<2x256xf32, #tpu.memory_space<vmem>>, vector<1x8xf32>,
    %115 = vector.extract_strided_slice %112 {offsets = [1, 0], sizes = [1, 8], strides = [1, 1]} : vector<8x8xf32> to vector<1x8xf32>
    %c1_65 = arith.constant 1 : index
    %c72_66 = arith.constant 72 : index
    %116 = vector.load %arg4[%c1_65, %c72_66] : memref<2x256xf32, #tpu.memory_space<vmem>>, vector<1x8xf32>
    tpu.vector_store %arg4[%c1_65, %c72_66], %115 {strides = array<i32>} : memref<2x256xf32, #tpu.memory_space<vmem>>, vector<1x8xf32>,
    %117 = vector.extract_strided_slice %112 {offsets = [2, 0], sizes = [1, 8], strides = [1, 1]} : vector<8x8xf32> to vector<1x8xf32>
    %c1_67 = arith.constant 1 : index
    %c80_68 = arith.constant 80 : index
    %118 = vector.load %arg4[%c1_67, %c80_68] : memref<2x256xf32, #tpu.memory_space<vmem>>, vector<1x8xf32>
    tpu.vector_store %arg4[%c1_67, %c80_68], %117 {strides = array<i32>} : memref<2x256xf32, #tpu.memory_space<vmem>>, vector<1x8xf32>,
    %119 = vector.extract_strided_slice %112 {offsets = [3, 0], sizes = [1, 8], strides = [1, 1]} : vector<8x8xf32> to vector<1x8xf32>
    %c1_69 = arith.constant 1 : index
    %c88_70 = arith.constant 88 : index
    %120 = vector.load %arg4[%c1_69, %c88_70] : memref<2x256xf32, #tpu.memory_space<vmem>>, vector<1x8xf32>
    tpu.vector_store %arg4[%c1_69, %c88_70], %119 {strides = array<i32>} : memref<2x256xf32, #tpu.memory_space<vmem>>, vector<1x8xf32>,
    %121 = vector.extract_strided_slice %112 {offsets = [4, 0], sizes = [1, 8], strides = [1, 1]} : vector<8x8xf32> to vector<1x8xf32>
    %c1_71 = arith.constant 1 : index
    %c96_72 = arith.constant 96 : index
    %122 = vector.load %arg4[%c1_71, %c96_72] : memref<2x256xf32, #tpu.memory_space<vmem>>, vector<1x8xf32>
    tpu.vector_store %arg4[%c1_71, %c96_72], %121 {strides = array<i32>} : memref<2x256xf32, #tpu.memory_space<vmem>>, vector<1x8xf32>,
    %123 = vector.extract_strided_slice %112 {offsets = [5, 0], sizes = [1, 8], strides = [1, 1]} : vector<8x8xf32> to vector<1x8xf32>
    %c1_73 = arith.constant 1 : index
    %c104_74 = arith.constant 104 : index
    %124 = vector.load %arg4[%c1_73, %c104_74] : memref<2x256xf32, #tpu.memory_space<vmem>>, vector<1x8xf32>
    tpu.vector_store %arg4[%c1_73, %c104_74], %123 {strides = array<i32>} : memref<2x256xf32, #tpu.memory_space<vmem>>, vector<1x8xf32>,
    %125 = vector.extract_strided_slice %112 {offsets = [6, 0], sizes = [1, 8], strides = [1, 1]} : vector<8x8xf32> to vector<1x8xf32>
    %c1_75 = arith.constant 1 : index
    %c112_76 = arith.constant 112 : index
    %126 = vector.load %arg4[%c1_75, %c112_76] : memref<2x256xf32, #tpu.memory_space<vmem>>, vector<1x8xf32>
    tpu.vector_store %arg4[%c1_75, %c112_76], %125 {strides = array<i32>} : memref<2x256xf32, #tpu.memory_space<vmem>>, vector<1x8xf32>,
    %127 = vector.extract_strided_slice %112 {offsets = [7, 0], sizes = [1, 8], strides = [1, 1]} : vector<8x8xf32> to vector<1x8xf32>
    %c1_77 = arith.constant 1 : index
    %c120_78 = arith.constant 120 : index
    %128 = vector.load %arg4[%c1_77, %c120_78] : memref<2x256xf32, #tpu.memory_space<vmem>>, vector<1x8xf32>
    tpu.vector_store %arg4[%c1_77, %c120_78], %127 {strides = array<i32>} : memref<2x256xf32, #tpu.memory_space<vmem>>, vector<1x8xf32>,
    %129 = vector.extract_strided_slice %19 {offsets = [1, 2, 0, 0], sizes = [1, 1, 8, 8], strides = [1, 1, 1, 1]} : vector<2x4x8x8xf32> to vector<1x1x8x8xf32>
    %130 = vector.shape_cast %129 : vector<1x1x8x8xf32> to vector<8x8xf32>
    %131 = vector.extract_strided_slice %130 {offsets = [0, 0], sizes = [1, 8], strides = [1, 1]} : vector<8x8xf32> to vector<1x8xf32>
    %c1_79 = arith.constant 1 : index
    %c128_80 = arith.constant 128 : index
    %132 = vector.load %arg4[%c1_79, %c128_80] : memref<2x256xf32, #tpu.memory_space<vmem>>, vector<1x8xf32>
    tpu.vector_store %arg4[%c1_79, %c128_80], %131 {strides = array<i32>} : memref<2x256xf32, #tpu.memory_space<vmem>>, vector<1x8xf32>,
    %133 = vector.extract_strided_slice %130 {offsets = [1, 0], sizes = [1, 8], strides = [1, 1]} : vector<8x8xf32> to vector<1x8xf32>
    %c1_81 = arith.constant 1 : index
    %c136_82 = arith.constant 136 : index
    %134 = vector.load %arg4[%c1_81, %c136_82] : memref<2x256xf32, #tpu.memory_space<vmem>>, vector<1x8xf32>
    tpu.vector_store %arg4[%c1_81, %c136_82], %133 {strides = array<i32>} : memref<2x256xf32, #tpu.memory_space<vmem>>, vector<1x8xf32>,
    %135 = vector.extract_strided_slice %130 {offsets = [2, 0], sizes = [1, 8], strides = [1, 1]} : vector<8x8xf32> to vector<1x8xf32>
    %c1_83 = arith.constant 1 : index
    %c144_84 = arith.constant 144 : index
    %136 = vector.load %arg4[%c1_83, %c144_84] : memref<2x256xf32, #tpu.memory_space<vmem>>, vector<1x8xf32>
    tpu.vector_store %arg4[%c1_83, %c144_84], %135 {strides = array<i32>} : memref<2x256xf32, #tpu.memory_space<vmem>>, vector<1x8xf32>,
    %137 = vector.extract_strided_slice %130 {offsets = [3, 0], sizes = [1, 8], strides = [1, 1]} : vector<8x8xf32> to vector<1x8xf32>
    %c1_85 = arith.constant 1 : index
    %c152_86 = arith.constant 152 : index
    %138 = vector.load %arg4[%c1_85, %c152_86] : memref<2x256xf32, #tpu.memory_space<vmem>>, vector<1x8xf32>
    tpu.vector_store %arg4[%c1_85, %c152_86], %137 {strides = array<i32>} : memref<2x256xf32, #tpu.memory_space<vmem>>, vector<1x8xf32>,
    %139 = vector.extract_strided_slice %130 {offsets = [4, 0], sizes = [1, 8], strides = [1, 1]} : vector<8x8xf32> to vector<1x8xf32>
    %c1_87 = arith.constant 1 : index
    %c160_88 = arith.constant 160 : index
    %140 = vector.load %arg4[%c1_87, %c160_88] : memref<2x256xf32, #tpu.memory_space<vmem>>, vector<1x8xf32>
    tpu.vector_store %arg4[%c1_87, %c160_88], %139 {strides = array<i32>} : memref<2x256xf32, #tpu.memory_space<vmem>>, vector<1x8xf32>,
    %141 = vector.extract_strided_slice %130 {offsets = [5, 0], sizes = [1, 8], strides = [1, 1]} : vector<8x8xf32> to vector<1x8xf32>
    %c1_89 = arith.constant 1 : index
    %c168_90 = arith.constant 168 : index
    %142 = vector.load %arg4[%c1_89, %c168_90] : memref<2x256xf32, #tpu.memory_space<vmem>>, vector<1x8xf32>
    tpu.vector_store %arg4[%c1_89, %c168_90], %141 {strides = array<i32>} : memref<2x256xf32, #tpu.memory_space<vmem>>, vector<1x8xf32>,
    %143 = vector.extract_strided_slice %130 {offsets = [6, 0], sizes = [1, 8], strides = [1, 1]} : vector<8x8xf32> to vector<1x8xf32>
    %c1_91 = arith.constant 1 : index
    %c176_92 = arith.constant 176 : index
    %144 = vector.load %arg4[%c1_91, %c176_92] : memref<2x256xf32, #tpu.memory_space<vmem>>, vector<1x8xf32>
    tpu.vector_store %arg4[%c1_91, %c176_92], %143 {strides = array<i32>} : memref<2x256xf32, #tpu.memory_space<vmem>>, vector<1x8xf32>,
    %145 = vector.extract_strided_slice %130 {offsets = [7, 0], sizes = [1, 8], strides = [1, 1]} : vector<8x8xf32> to vector<1x8xf32>
    %c1_93 = arith.constant 1 : index
    %c184_94 = arith.constant 184 : index
    %146 = vector.load %arg4[%c1_93, %c184_94] : memref<2x256xf32, #tpu.memory_space<vmem>>, vector<1x8xf32>
    tpu.vector_store %arg4[%c1_93, %c184_94], %145 {strides = array<i32>} : memref<2x256xf32, #tpu.memory_space<vmem>>, vector<1x8xf32>,
    %147 = vector.extract_strided_slice %19 {offsets = [1, 3, 0, 0], sizes = [1, 1, 8, 8], strides = [1, 1, 1, 1]} : vector<2x4x8x8xf32> to vector<1x1x8x8xf32>
    %148 = vector.shape_cast %147 : vector<1x1x8x8xf32> to vector<8x8xf32>
    %149 = vector.extract_strided_slice %148 {offsets = [0, 0], sizes = [1, 8], strides = [1, 1]} : vector<8x8xf32> to vector<1x8xf32>
    %c1_95 = arith.constant 1 : index
    %c192_96 = arith.constant 192 : index
    %150 = vector.load %arg4[%c1_95, %c192_96] : memref<2x256xf32, #tpu.memory_space<vmem>>, vector<1x8xf32>
    tpu.vector_store %arg4[%c1_95, %c192_96], %149 {strides = array<i32>} : memref<2x256xf32, #tpu.memory_space<vmem>>, vector<1x8xf32>,
    %151 = vector.extract_strided_slice %148 {offsets = [1, 0], sizes = [1, 8], strides = [1, 1]} : vector<8x8xf32> to vector<1x8xf32>
    %c1_97 = arith.constant 1 : index
    %c200_98 = arith.constant 200 : index
    %152 = vector.load %arg4[%c1_97, %c200_98] : memref<2x256xf32, #tpu.memory_space<vmem>>, vector<1x8xf32>
    tpu.vector_store %arg4[%c1_97, %c200_98], %151 {strides = array<i32>} : memref<2x256xf32, #tpu.memory_space<vmem>>, vector<1x8xf32>,
    %153 = vector.extract_strided_slice %148 {offsets = [2, 0], sizes = [1, 8], strides = [1, 1]} : vector<8x8xf32> to vector<1x8xf32>
    %c1_99 = arith.constant 1 : index
    %c208_100 = arith.constant 208 : index
    %154 = vector.load %arg4[%c1_99, %c208_100] : memref<2x256xf32, #tpu.memory_space<vmem>>, vector<1x8xf32>
    tpu.vector_store %arg4[%c1_99, %c208_100], %153 {strides = array<i32>} : memref<2x256xf32, #tpu.memory_space<vmem>>, vector<1x8xf32>,
    %155 = vector.extract_strided_slice %148 {offsets = [3, 0], sizes = [1, 8], strides = [1, 1]} : vector<8x8xf32> to vector<1x8xf32>
    %c1_101 = arith.constant 1 : index
    %c216_102 = arith.constant 216 : index
    %156 = vector.load %arg4[%c1_101, %c216_102] : memref<2x256xf32, #tpu.memory_space<vmem>>, vector<1x8xf32>
    tpu.vector_store %arg4[%c1_101, %c216_102], %155 {strides = array<i32>} : memref<2x256xf32, #tpu.memory_space<vmem>>, vector<1x8xf32>,
    %157 = vector.extract_strided_slice %148 {offsets = [4, 0], sizes = [1, 8], strides = [1, 1]} : vector<8x8xf32> to vector<1x8xf32>
    %c1_103 = arith.constant 1 : index
    %c224_104 = arith.constant 224 : index
    %158 = vector.load %arg4[%c1_103, %c224_104] : memref<2x256xf32, #tpu.memory_space<vmem>>, vector<1x8xf32>
    tpu.vector_store %arg4[%c1_103, %c224_104], %157 {strides = array<i32>} : memref<2x256xf32, #tpu.memory_space<vmem>>, vector<1x8xf32>,
    %159 = vector.extract_strided_slice %148 {offsets = [5, 0], sizes = [1, 8], strides = [1, 1]} : vector<8x8xf32> to vector<1x8xf32>
    %c1_105 = arith.constant 1 : index
    %c232_106 = arith.constant 232 : index
    %160 = vector.load %arg4[%c1_105, %c232_106] : memref<2x256xf32, #tpu.memory_space<vmem>>, vector<1x8xf32>
    tpu.vector_store %arg4[%c1_105, %c232_106], %159 {strides = array<i32>} : memref<2x256xf32, #tpu.memory_space<vmem>>, vector<1x8xf32>,
    %161 = vector.extract_strided_slice %148 {offsets = [6, 0], sizes = [1, 8], strides = [1, 1]} : vector<8x8xf32> to vector<1x8xf32>
    %c1_107 = arith.constant 1 : index
    %c240_108 = arith.constant 240 : index
    %162 = vector.load %arg4[%c1_107, %c240_108] : memref<2x256xf32, #tpu.memory_space<vmem>>, vector<1x8xf32>
    tpu.vector_store %arg4[%c1_107, %c240_108], %161 {strides = array<i32>} : memref<2x256xf32, #tpu.memory_space<vmem>>, vector<1x8xf32>,
    %163 = vector.extract_strided_slice %148 {offsets = [7, 0], sizes = [1, 8], strides = [1, 1]} : vector<8x8xf32> to vector<1x8xf32>
    %c1_109 = arith.constant 1 : index
    %c248_110 = arith.constant 248 : index
    %164 = vector.load %arg4[%c1_109, %c248_110] : memref<2x256xf32, #tpu.memory_space<vmem>>, vector<1x8xf32>
    tpu.vector_store %arg4[%c1_109, %c248_110], %163 {strides = array<i32>} : memref<2x256xf32, #tpu.memory_space<vmem>>, vector<1x8xf32>,
    %165 = vector.extract_strided_slice %20 {offsets = [0, 0, 0, 0], sizes = [1, 1, 8, 8], strides = [1, 1, 1, 1]} : vector<2x4x8x8xf32> to vector<1x1x8x8xf32>
    %166 = vector.shape_cast %165 : vector<1x1x8x8xf32> to vector<8x8xf32>
    %167 = vector.extract_strided_slice %166 {offsets = [0, 0], sizes = [1, 8], strides = [1, 1]} : vector<8x8xf32> to vector<1x8xf32>
    %c0_111 = arith.constant 0 : index
    %c0_112 = arith.constant 0 : index
    %168 = vector.load %arg5[%c0_111, %c0_112] : memref<2x256xf32, #tpu.memory_space<vmem>>, vector<1x8xf32>
    tpu.vector_store %arg5[%c0_111, %c0_112], %167 {strides = array<i32>} : memref<2x256xf32, #tpu.memory_space<vmem>>, vector<1x8xf32>,
    %169 = vector.extract_strided_slice %166 {offsets = [1, 0], sizes = [1, 8], strides = [1, 1]} : vector<8x8xf32> to vector<1x8xf32>
    %c0_113 = arith.constant 0 : index
    %c8_114 = arith.constant 8 : index
    %170 = vector.load %arg5[%c0_113, %c8_114] : memref<2x256xf32, #tpu.memory_space<vmem>>, vector<1x8xf32>
    tpu.vector_store %arg5[%c0_113, %c8_114], %169 {strides = array<i32>} : memref<2x256xf32, #tpu.memory_space<vmem>>, vector<1x8xf32>,
    %171 = vector.extract_strided_slice %166 {offsets = [2, 0], sizes = [1, 8], strides = [1, 1]} : vector<8x8xf32> to vector<1x8xf32>
    %c0_115 = arith.constant 0 : index
    %c16_116 = arith.constant 16 : index
    %172 = vector.load %arg5[%c0_115, %c16_116] : memref<2x256xf32, #tpu.memory_space<vmem>>, vector<1x8xf32>
    tpu.vector_store %arg5[%c0_115, %c16_116], %171 {strides = array<i32>} : memref<2x256xf32, #tpu.memory_space<vmem>>, vector<1x8xf32>,
    %173 = vector.extract_strided_slice %166 {offsets = [3, 0], sizes = [1, 8], strides = [1, 1]} : vector<8x8xf32> to vector<1x8xf32>
    %c0_117 = arith.constant 0 : index
    %c24_118 = arith.constant 24 : index
    %174 = vector.load %arg5[%c0_117, %c24_118] : memref<2x256xf32, #tpu.memory_space<vmem>>, vector<1x8xf32>
    tpu.vector_store %arg5[%c0_117, %c24_118], %173 {strides = array<i32>} : memref<2x256xf32, #tpu.memory_space<vmem>>, vector<1x8xf32>,
    %175 = vector.extract_strided_slice %166 {offsets = [4, 0], sizes = [1, 8], strides = [1, 1]} : vector<8x8xf32> to vector<1x8xf32>
    %c0_119 = arith.constant 0 : index
    %c32_120 = arith.constant 32 : index
    %176 = vector.load %arg5[%c0_119, %c32_120] : memref<2x256xf32, #tpu.memory_space<vmem>>, vector<1x8xf32>
    tpu.vector_store %arg5[%c0_119, %c32_120], %175 {strides = array<i32>} : memref<2x256xf32, #tpu.memory_space<vmem>>, vector<1x8xf32>,
    %177 = vector.extract_strided_slice %166 {offsets = [5, 0], sizes = [1, 8], strides = [1, 1]} : vector<8x8xf32> to vector<1x8xf32>
    %c0_121 = arith.constant 0 : index
    %c40_122 = arith.constant 40 : index
    %178 = vector.load %arg5[%c0_121, %c40_122] : memref<2x256xf32, #tpu.memory_space<vmem>>, vector<1x8xf32>
    tpu.vector_store %arg5[%c0_121, %c40_122], %177 {strides = array<i32>} : memref<2x256xf32, #tpu.memory_space<vmem>>, vector<1x8xf32>,
    %179 = vector.extract_strided_slice %166 {offsets = [6, 0], sizes = [1, 8], strides = [1, 1]} : vector<8x8xf32> to vector<1x8xf32>
    %c0_123 = arith.constant 0 : index
    %c48_124 = arith.constant 48 : index
    %180 = vector.load %arg5[%c0_123, %c48_124] : memref<2x256xf32, #tpu.memory_space<vmem>>, vector<1x8xf32>
    tpu.vector_store %arg5[%c0_123, %c48_124], %179 {strides = array<i32>} : memref<2x256xf32, #tpu.memory_space<vmem>>, vector<1x8xf32>,
    %181 = vector.extract_strided_slice %166 {offsets = [7, 0], sizes = [1, 8], strides = [1, 1]} : vector<8x8xf32> to vector<1x8xf32>
    %c0_125 = arith.constant 0 : index
    %c56_126 = arith.constant 56 : index
    %182 = vector.load %arg5[%c0_125, %c56_126] : memref<2x256xf32, #tpu.memory_space<vmem>>, vector<1x8xf32>
    tpu.vector_store %arg5[%c0_125, %c56_126], %181 {strides = array<i32>} : memref<2x256xf32, #tpu.memory_space<vmem>>, vector<1x8xf32>,
    %183 = vector.extract_strided_slice %20 {offsets = [0, 1, 0, 0], sizes = [1, 1, 8, 8], strides = [1, 1, 1, 1]} : vector<2x4x8x8xf32> to vector<1x1x8x8xf32>
    %184 = vector.shape_cast %183 : vector<1x1x8x8xf32> to vector<8x8xf32>
    %185 = vector.extract_strided_slice %184 {offsets = [0, 0], sizes = [1, 8], strides = [1, 1]} : vector<8x8xf32> to vector<1x8xf32>
    %c0_127 = arith.constant 0 : index
    %c64_128 = arith.constant 64 : index
    %186 = vector.load %arg5[%c0_127, %c64_128] : memref<2x256xf32, #tpu.memory_space<vmem>>, vector<1x8xf32>
    tpu.vector_store %arg5[%c0_127, %c64_128], %185 {strides = array<i32>} : memref<2x256xf32, #tpu.memory_space<vmem>>, vector<1x8xf32>,
    %187 = vector.extract_strided_slice %184 {offsets = [1, 0], sizes = [1, 8], strides = [1, 1]} : vector<8x8xf32> to vector<1x8xf32>
    %c0_129 = arith.constant 0 : index
    %c72_130 = arith.constant 72 : index
    %188 = vector.load %arg5[%c0_129, %c72_130] : memref<2x256xf32, #tpu.memory_space<vmem>>, vector<1x8xf32>
    tpu.vector_store %arg5[%c0_129, %c72_130], %187 {strides = array<i32>} : memref<2x256xf32, #tpu.memory_space<vmem>>, vector<1x8xf32>,
    %189 = vector.extract_strided_slice %184 {offsets = [2, 0], sizes = [1, 8], strides = [1, 1]} : vector<8x8xf32> to vector<1x8xf32>
    %c0_131 = arith.constant 0 : index
    %c80_132 = arith.constant 80 : index
    %190 = vector.load %arg5[%c0_131, %c80_132] : memref<2x256xf32, #tpu.memory_space<vmem>>, vector<1x8xf32>
    tpu.vector_store %arg5[%c0_131, %c80_132], %189 {strides = array<i32>} : memref<2x256xf32, #tpu.memory_space<vmem>>, vector<1x8xf32>,
    %191 = vector.extract_strided_slice %184 {offsets = [3, 0], sizes = [1, 8], strides = [1, 1]} : vector<8x8xf32> to vector<1x8xf32>
    %c0_133 = arith.constant 0 : index
    %c88_134 = arith.constant 88 : index
    %192 = vector.load %arg5[%c0_133, %c88_134] : memref<2x256xf32, #tpu.memory_space<vmem>>, vector<1x8xf32>
    tpu.vector_store %arg5[%c0_133, %c88_134], %191 {strides = array<i32>} : memref<2x256xf32, #tpu.memory_space<vmem>>, vector<1x8xf32>,
    %193 = vector.extract_strided_slice %184 {offsets = [4, 0], sizes = [1, 8], strides = [1, 1]} : vector<8x8xf32> to vector<1x8xf32>
    %c0_135 = arith.constant 0 : index
    %c96_136 = arith.constant 96 : index
    %194 = vector.load %arg5[%c0_135, %c96_136] : memref<2x256xf32, #tpu.memory_space<vmem>>, vector<1x8xf32>
    tpu.vector_store %arg5[%c0_135, %c96_136], %193 {strides = array<i32>} : memref<2x256xf32, #tpu.memory_space<vmem>>, vector<1x8xf32>,
    %195 = vector.extract_strided_slice %184 {offsets = [5, 0], sizes = [1, 8], strides = [1, 1]} : vector<8x8xf32> to vector<1x8xf32>
    %c0_137 = arith.constant 0 : index
    %c104_138 = arith.constant 104 : index
    %196 = vector.load %arg5[%c0_137, %c104_138] : memref<2x256xf32, #tpu.memory_space<vmem>>, vector<1x8xf32>
    tpu.vector_store %arg5[%c0_137, %c104_138], %195 {strides = array<i32>} : memref<2x256xf32, #tpu.memory_space<vmem>>, vector<1x8xf32>,
    %197 = vector.extract_strided_slice %184 {offsets = [6, 0], sizes = [1, 8], strides = [1, 1]} : vector<8x8xf32> to vector<1x8xf32>
    %c0_139 = arith.constant 0 : index
    %c112_140 = arith.constant 112 : index
    %198 = vector.load %arg5[%c0_139, %c112_140] : memref<2x256xf32, #tpu.memory_space<vmem>>, vector<1x8xf32>
    tpu.vector_store %arg5[%c0_139, %c112_140], %197 {strides = array<i32>} : memref<2x256xf32, #tpu.memory_space<vmem>>, vector<1x8xf32>,
    %199 = vector.extract_strided_slice %184 {offsets = [7, 0], sizes = [1, 8], strides = [1, 1]} : vector<8x8xf32> to vector<1x8xf32>
    %c0_141 = arith.constant 0 : index
    %c120_142 = arith.constant 120 : index
    %200 = vector.load %arg5[%c0_141, %c120_142] : memref<2x256xf32, #tpu.memory_space<vmem>>, vector<1x8xf32>
    tpu.vector_store %arg5[%c0_141, %c120_142], %199 {strides = array<i32>} : memref<2x256xf32, #tpu.memory_space<vmem>>, vector<1x8xf32>,
    %201 = vector.extract_strided_slice %20 {offsets = [0, 2, 0, 0], sizes = [1, 1, 8, 8], strides = [1, 1, 1, 1]} : vector<2x4x8x8xf32> to vector<1x1x8x8xf32>
    %202 = vector.shape_cast %201 : vector<1x1x8x8xf32> to vector<8x8xf32>
    %203 = vector.extract_strided_slice %202 {offsets = [0, 0], sizes = [1, 8], strides = [1, 1]} : vector<8x8xf32> to vector<1x8xf32>
    %c0_143 = arith.constant 0 : index
    %c128_144 = arith.constant 128 : index
    %204 = vector.load %arg5[%c0_143, %c128_144] : memref<2x256xf32, #tpu.memory_space<vmem>>, vector<1x8xf32>
    tpu.vector_store %arg5[%c0_143, %c128_144], %203 {strides = array<i32>} : memref<2x256xf32, #tpu.memory_space<vmem>>, vector<1x8xf32>,
    %205 = vector.extract_strided_slice %202 {offsets = [1, 0], sizes = [1, 8], strides = [1, 1]} : vector<8x8xf32> to vector<1x8xf32>
    %c0_145 = arith.constant 0 : index
    %c136_146 = arith.constant 136 : index
    %206 = vector.load %arg5[%c0_145, %c136_146] : memref<2x256xf32, #tpu.memory_space<vmem>>, vector<1x8xf32>
    tpu.vector_store %arg5[%c0_145, %c136_146], %205 {strides = array<i32>} : memref<2x256xf32, #tpu.memory_space<vmem>>, vector<1x8xf32>,
    %207 = vector.extract_strided_slice %202 {offsets = [2, 0], sizes = [1, 8], strides = [1, 1]} : vector<8x8xf32> to vector<1x8xf32>
    %c0_147 = arith.constant 0 : index
    %c144_148 = arith.constant 144 : index
    %208 = vector.load %arg5[%c0_147, %c144_148] : memref<2x256xf32, #tpu.memory_space<vmem>>, vector<1x8xf32>
    tpu.vector_store %arg5[%c0_147, %c144_148], %207 {strides = array<i32>} : memref<2x256xf32, #tpu.memory_space<vmem>>, vector<1x8xf32>,
    %209 = vector.extract_strided_slice %202 {offsets = [3, 0], sizes = [1, 8], strides = [1, 1]} : vector<8x8xf32> to vector<1x8xf32>
    %c0_149 = arith.constant 0 : index
    %c152_150 = arith.constant 152 : index
    %210 = vector.load %arg5[%c0_149, %c152_150] : memref<2x256xf32, #tpu.memory_space<vmem>>, vector<1x8xf32>
    tpu.vector_store %arg5[%c0_149, %c152_150], %209 {strides = array<i32>} : memref<2x256xf32, #tpu.memory_space<vmem>>, vector<1x8xf32>,
    %211 = vector.extract_strided_slice %202 {offsets = [4, 0], sizes = [1, 8], strides = [1, 1]} : vector<8x8xf32> to vector<1x8xf32>
    %c0_151 = arith.constant 0 : index
    %c160_152 = arith.constant 160 : index
    %212 = vector.load %arg5[%c0_151, %c160_152] : memref<2x256xf32, #tpu.memory_space<vmem>>, vector<1x8xf32>
    tpu.vector_store %arg5[%c0_151, %c160_152], %211 {strides = array<i32>} : memref<2x256xf32, #tpu.memory_space<vmem>>, vector<1x8xf32>,
    %213 = vector.extract_strided_slice %202 {offsets = [5, 0], sizes = [1, 8], strides = [1, 1]} : vector<8x8xf32> to vector<1x8xf32>
    %c0_153 = arith.constant 0 : index
    %c168_154 = arith.constant 168 : index
    %214 = vector.load %arg5[%c0_153, %c168_154] : memref<2x256xf32, #tpu.memory_space<vmem>>, vector<1x8xf32>
    tpu.vector_store %arg5[%c0_153, %c168_154], %213 {strides = array<i32>} : memref<2x256xf32, #tpu.memory_space<vmem>>, vector<1x8xf32>,
    %215 = vector.extract_strided_slice %202 {offsets = [6, 0], sizes = [1, 8], strides = [1, 1]} : vector<8x8xf32> to vector<1x8xf32>
    %c0_155 = arith.constant 0 : index
    %c176_156 = arith.constant 176 : index
    %216 = vector.load %arg5[%c0_155, %c176_156] : memref<2x256xf32, #tpu.memory_space<vmem>>, vector<1x8xf32>
    tpu.vector_store %arg5[%c0_155, %c176_156], %215 {strides = array<i32>} : memref<2x256xf32, #tpu.memory_space<vmem>>, vector<1x8xf32>,
    %217 = vector.extract_strided_slice %202 {offsets = [7, 0], sizes = [1, 8], strides = [1, 1]} : vector<8x8xf32> to vector<1x8xf32>
    %c0_157 = arith.constant 0 : index
    %c184_158 = arith.constant 184 : index
    %218 = vector.load %arg5[%c0_157, %c184_158] : memref<2x256xf32, #tpu.memory_space<vmem>>, vector<1x8xf32>
    tpu.vector_store %arg5[%c0_157, %c184_158], %217 {strides = array<i32>} : memref<2x256xf32, #tpu.memory_space<vmem>>, vector<1x8xf32>,
    %219 = vector.extract_strided_slice %20 {offsets = [0, 3, 0, 0], sizes = [1, 1, 8, 8], strides = [1, 1, 1, 1]} : vector<2x4x8x8xf32> to vector<1x1x8x8xf32>
    %220 = vector.shape_cast %219 : vector<1x1x8x8xf32> to vector<8x8xf32>
    %221 = vector.extract_strided_slice %220 {offsets = [0, 0], sizes = [1, 8], strides = [1, 1]} : vector<8x8xf32> to vector<1x8xf32>
    %c0_159 = arith.constant 0 : index
    %c192_160 = arith.constant 192 : index
    %222 = vector.load %arg5[%c0_159, %c192_160] : memref<2x256xf32, #tpu.memory_space<vmem>>, vector<1x8xf32>
    tpu.vector_store %arg5[%c0_159, %c192_160], %221 {strides = array<i32>} : memref<2x256xf32, #tpu.memory_space<vmem>>, vector<1x8xf32>,
    %223 = vector.extract_strided_slice %220 {offsets = [1, 0], sizes = [1, 8], strides = [1, 1]} : vector<8x8xf32> to vector<1x8xf32>
    %c0_161 = arith.constant 0 : index
    %c200_162 = arith.constant 200 : index
    %224 = vector.load %arg5[%c0_161, %c200_162] : memref<2x256xf32, #tpu.memory_space<vmem>>, vector<1x8xf32>
    tpu.vector_store %arg5[%c0_161, %c200_162], %223 {strides = array<i32>} : memref<2x256xf32, #tpu.memory_space<vmem>>, vector<1x8xf32>,
    %225 = vector.extract_strided_slice %220 {offsets = [2, 0], sizes = [1, 8], strides = [1, 1]} : vector<8x8xf32> to vector<1x8xf32>
    %c0_163 = arith.constant 0 : index
    %c208_164 = arith.constant 208 : index
    %226 = vector.load %arg5[%c0_163, %c208_164] : memref<2x256xf32, #tpu.memory_space<vmem>>, vector<1x8xf32>
    tpu.vector_store %arg5[%c0_163, %c208_164], %225 {strides = array<i32>} : memref<2x256xf32, #tpu.memory_space<vmem>>, vector<1x8xf32>,
    %227 = vector.extract_strided_slice %220 {offsets = [3, 0], sizes = [1, 8], strides = [1, 1]} : vector<8x8xf32> to vector<1x8xf32>
    %c0_165 = arith.constant 0 : index
    %c216_166 = arith.constant 216 : index
    %228 = vector.load %arg5[%c0_165, %c216_166] : memref<2x256xf32, #tpu.memory_space<vmem>>, vector<1x8xf32>
    tpu.vector_store %arg5[%c0_165, %c216_166], %227 {strides = array<i32>} : memref<2x256xf32, #tpu.memory_space<vmem>>, vector<1x8xf32>,
    %229 = vector.extract_strided_slice %220 {offsets = [4, 0], sizes = [1, 8], strides = [1, 1]} : vector<8x8xf32> to vector<1x8xf32>
    %c0_167 = arith.constant 0 : index
    %c224_168 = arith.constant 224 : index
    %230 = vector.load %arg5[%c0_167, %c224_168] : memref<2x256xf32, #tpu.memory_space<vmem>>, vector<1x8xf32>
    tpu.vector_store %arg5[%c0_167, %c224_168], %229 {strides = array<i32>} : memref<2x256xf32, #tpu.memory_space<vmem>>, vector<1x8xf32>,
    %231 = vector.extract_strided_slice %220 {offsets = [5, 0], sizes = [1, 8], strides = [1, 1]} : vector<8x8xf32> to vector<1x8xf32>
    %c0_169 = arith.constant 0 : index
    %c232_170 = arith.constant 232 : index
    %232 = vector.load %arg5[%c0_169, %c232_170] : memref<2x256xf32, #tpu.memory_space<vmem>>, vector<1x8xf32>
    tpu.vector_store %arg5[%c0_169, %c232_170], %231 {strides = array<i32>} : memref<2x256xf32, #tpu.memory_space<vmem>>, vector<1x8xf32>,
    %233 = vector.extract_strided_slice %220 {offsets = [6, 0], sizes = [1, 8], strides = [1, 1]} : vector<8x8xf32> to vector<1x8xf32>
    %c0_171 = arith.constant 0 : index
    %c240_172 = arith.constant 240 : index
    %234 = vector.load %arg5[%c0_171, %c240_172] : memref<2x256xf32, #tpu.memory_space<vmem>>, vector<1x8xf32>
    tpu.vector_store %arg5[%c0_171, %c240_172], %233 {strides = array<i32>} : memref<2x256xf32, #tpu.memory_space<vmem>>, vector<1x8xf32>,
    %235 = vector.extract_strided_slice %220 {offsets = [7, 0], sizes = [1, 8], strides = [1, 1]} : vector<8x8xf32> to vector<1x8xf32>
    %c0_173 = arith.constant 0 : index
    %c248_174 = arith.constant 248 : index
    %236 = vector.load %arg5[%c0_173, %c248_174] : memref<2x256xf32, #tpu.memory_space<vmem>>, vector<1x8xf32>
    tpu.vector_store %arg5[%c0_173, %c248_174], %235 {strides = array<i32>} : memref<2x256xf32, #tpu.memory_space<vmem>>, vector<1x8xf32>,
    %237 = vector.extract_strided_slice %20 {offsets = [1, 0, 0, 0], sizes = [1, 1, 8, 8], strides = [1, 1, 1, 1]} : vector<2x4x8x8xf32> to vector<1x1x8x8xf32>
    %238 = vector.shape_cast %237 : vector<1x1x8x8xf32> to vector<8x8xf32>
    %239 = vector.extract_strided_slice %238 {offsets = [0, 0], sizes = [1, 8], strides = [1, 1]} : vector<8x8xf32> to vector<1x8xf32>
    %c1_175 = arith.constant 1 : index
    %c0_176 = arith.constant 0 : index
    %240 = vector.load %arg5[%c1_175, %c0_176] : memref<2x256xf32, #tpu.memory_space<vmem>>, vector<1x8xf32>
    tpu.vector_store %arg5[%c1_175, %c0_176], %239 {strides = array<i32>} : memref<2x256xf32, #tpu.memory_space<vmem>>, vector<1x8xf32>,
    %241 = vector.extract_strided_slice %238 {offsets = [1, 0], sizes = [1, 8], strides = [1, 1]} : vector<8x8xf32> to vector<1x8xf32>
    %c1_177 = arith.constant 1 : index
    %c8_178 = arith.constant 8 : index
    %242 = vector.load %arg5[%c1_177, %c8_178] : memref<2x256xf32, #tpu.memory_space<vmem>>, vector<1x8xf32>
    tpu.vector_store %arg5[%c1_177, %c8_178], %241 {strides = array<i32>} : memref<2x256xf32, #tpu.memory_space<vmem>>, vector<1x8xf32>,
    %243 = vector.extract_strided_slice %238 {offsets = [2, 0], sizes = [1, 8], strides = [1, 1]} : vector<8x8xf32> to vector<1x8xf32>
    %c1_179 = arith.constant 1 : index
    %c16_180 = arith.constant 16 : index
    %244 = vector.load %arg5[%c1_179, %c16_180] : memref<2x256xf32, #tpu.memory_space<vmem>>, vector<1x8xf32>
    tpu.vector_store %arg5[%c1_179, %c16_180], %243 {strides = array<i32>} : memref<2x256xf32, #tpu.memory_space<vmem>>, vector<1x8xf32>,
    %245 = vector.extract_strided_slice %238 {offsets = [3, 0], sizes = [1, 8], strides = [1, 1]} : vector<8x8xf32> to vector<1x8xf32>
    %c1_181 = arith.constant 1 : index
    %c24_182 = arith.constant 24 : index
    %246 = vector.load %arg5[%c1_181, %c24_182] : memref<2x256xf32, #tpu.memory_space<vmem>>, vector<1x8xf32>
    tpu.vector_store %arg5[%c1_181, %c24_182], %245 {strides = array<i32>} : memref<2x256xf32, #tpu.memory_space<vmem>>, vector<1x8xf32>,
    %247 = vector.extract_strided_slice %238 {offsets = [4, 0], sizes = [1, 8], strides = [1, 1]} : vector<8x8xf32> to vector<1x8xf32>
    %c1_183 = arith.constant 1 : index
    %c32_184 = arith.constant 32 : index
    %248 = vector.load %arg5[%c1_183, %c32_184] : memref<2x256xf32, #tpu.memory_space<vmem>>, vector<1x8xf32>
    tpu.vector_store %arg5[%c1_183, %c32_184], %247 {strides = array<i32>} : memref<2x256xf32, #tpu.memory_space<vmem>>, vector<1x8xf32>,
    %249 = vector.extract_strided_slice %238 {offsets = [5, 0], sizes = [1, 8], strides = [1, 1]} : vector<8x8xf32> to vector<1x8xf32>
    %c1_185 = arith.constant 1 : index
    %c40_186 = arith.constant 40 : index
    %250 = vector.load %arg5[%c1_185, %c40_186] : memref<2x256xf32, #tpu.memory_space<vmem>>, vector<1x8xf32>
    tpu.vector_store %arg5[%c1_185, %c40_186], %249 {strides = array<i32>} : memref<2x256xf32, #tpu.memory_space<vmem>>, vector<1x8xf32>,
    %251 = vector.extract_strided_slice %238 {offsets = [6, 0], sizes = [1, 8], strides = [1, 1]} : vector<8x8xf32> to vector<1x8xf32>
    %c1_187 = arith.constant 1 : index
    %c48_188 = arith.constant 48 : index
    %252 = vector.load %arg5[%c1_187, %c48_188] : memref<2x256xf32, #tpu.memory_space<vmem>>, vector<1x8xf32>
    tpu.vector_store %arg5[%c1_187, %c48_188], %251 {strides = array<i32>} : memref<2x256xf32, #tpu.memory_space<vmem>>, vector<1x8xf32>,
    %253 = vector.extract_strided_slice %238 {offsets = [7, 0], sizes = [1, 8], strides = [1, 1]} : vector<8x8xf32> to vector<1x8xf32>
    %c1_189 = arith.constant 1 : index
    %c56_190 = arith.constant 56 : index
    %254 = vector.load %arg5[%c1_189, %c56_190] : memref<2x256xf32, #tpu.memory_space<vmem>>, vector<1x8xf32>
    tpu.vector_store %arg5[%c1_189, %c56_190], %253 {strides = array<i32>} : memref<2x256xf32, #tpu.memory_space<vmem>>, vector<1x8xf32>,
    %255 = vector.extract_strided_slice %20 {offsets = [1, 1, 0, 0], sizes = [1, 1, 8, 8], strides = [1, 1, 1, 1]} : vector<2x4x8x8xf32> to vector<1x1x8x8xf32>
    %256 = vector.shape_cast %255 : vector<1x1x8x8xf32> to vector<8x8xf32>
    %257 = vector.extract_strided_slice %256 {offsets = [0, 0], sizes = [1, 8], strides = [1, 1]} : vector<8x8xf32> to vector<1x8xf32>
    %c1_191 = arith.constant 1 : index
    %c64_192 = arith.constant 64 : index
    %258 = vector.load %arg5[%c1_191, %c64_192] : memref<2x256xf32, #tpu.memory_space<vmem>>, vector<1x8xf32>
    tpu.vector_store %arg5[%c1_191, %c64_192], %257 {strides = array<i32>} : memref<2x256xf32, #tpu.memory_space<vmem>>, vector<1x8xf32>,
    %259 = vector.extract_strided_slice %256 {offsets = [1, 0], sizes = [1, 8], strides = [1, 1]} : vector<8x8xf32> to vector<1x8xf32>
    %c1_193 = arith.constant 1 : index
    %c72_194 = arith.constant 72 : index
    %260 = vector.load %arg5[%c1_193, %c72_194] : memref<2x256xf32, #tpu.memory_space<vmem>>, vector<1x8xf32>
    tpu.vector_store %arg5[%c1_193, %c72_194], %259 {strides = array<i32>} : memref<2x256xf32, #tpu.memory_space<vmem>>, vector<1x8xf32>,
    %261 = vector.extract_strided_slice %256 {offsets = [2, 0], sizes = [1, 8], strides = [1, 1]} : vector<8x8xf32> to vector<1x8xf32>
    %c1_195 = arith.constant 1 : index
    %c80_196 = arith.constant 80 : index
    %262 = vector.load %arg5[%c1_195, %c80_196] : memref<2x256xf32, #tpu.memory_space<vmem>>, vector<1x8xf32>
    tpu.vector_store %arg5[%c1_195, %c80_196], %261 {strides = array<i32>} : memref<2x256xf32, #tpu.memory_space<vmem>>, vector<1x8xf32>,
    %263 = vector.extract_strided_slice %256 {offsets = [3, 0], sizes = [1, 8], strides = [1, 1]} : vector<8x8xf32> to vector<1x8xf32>
    %c1_197 = arith.constant 1 : index
    %c88_198 = arith.constant 88 : index
    %264 = vector.load %arg5[%c1_197, %c88_198] : memref<2x256xf32, #tpu.memory_space<vmem>>, vector<1x8xf32>
    tpu.vector_store %arg5[%c1_197, %c88_198], %263 {strides = array<i32>} : memref<2x256xf32, #tpu.memory_space<vmem>>, vector<1x8xf32>,
    %265 = vector.extract_strided_slice %256 {offsets = [4, 0], sizes = [1, 8], strides = [1, 1]} : vector<8x8xf32> to vector<1x8xf32>
    %c1_199 = arith.constant 1 : index
    %c96_200 = arith.constant 96 : index
    %266 = vector.load %arg5[%c1_199, %c96_200] : memref<2x256xf32, #tpu.memory_space<vmem>>, vector<1x8xf32>
    tpu.vector_store %arg5[%c1_199, %c96_200], %265 {strides = array<i32>} : memref<2x256xf32, #tpu.memory_space<vmem>>, vector<1x8xf32>,
    %267 = vector.extract_strided_slice %256 {offsets = [5, 0], sizes = [1, 8], strides = [1, 1]} : vector<8x8xf32> to vector<1x8xf32>
    %c1_201 = arith.constant 1 : index
    %c104_202 = arith.constant 104 : index
    %268 = vector.load %arg5[%c1_201, %c104_202] : memref<2x256xf32, #tpu.memory_space<vmem>>, vector<1x8xf32>
    tpu.vector_store %arg5[%c1_201, %c104_202], %267 {strides = array<i32>} : memref<2x256xf32, #tpu.memory_space<vmem>>, vector<1x8xf32>,
    %269 = vector.extract_strided_slice %256 {offsets = [6, 0], sizes = [1, 8], strides = [1, 1]} : vector<8x8xf32> to vector<1x8xf32>
    %c1_203 = arith.constant 1 : index
    %c112_204 = arith.constant 112 : index
    %270 = vector.load %arg5[%c1_203, %c112_204] : memref<2x256xf32, #tpu.memory_space<vmem>>, vector<1x8xf32>
    tpu.vector_store %arg5[%c1_203, %c112_204], %269 {strides = array<i32>} : memref<2x256xf32, #tpu.memory_space<vmem>>, vector<1x8xf32>,
    %271 = vector.extract_strided_slice %256 {offsets = [7, 0], sizes = [1, 8], strides = [1, 1]} : vector<8x8xf32> to vector<1x8xf32>
    %c1_205 = arith.constant 1 : index
    %c120_206 = arith.constant 120 : index
    %272 = vector.load %arg5[%c1_205, %c120_206] : memref<2x256xf32, #tpu.memory_space<vmem>>, vector<1x8xf32>
    tpu.vector_store %arg5[%c1_205, %c120_206], %271 {strides = array<i32>} : memref<2x256xf32, #tpu.memory_space<vmem>>, vector<1x8xf32>,
    %273 = vector.extract_strided_slice %20 {offsets = [1, 2, 0, 0], sizes = [1, 1, 8, 8], strides = [1, 1, 1, 1]} : vector<2x4x8x8xf32> to vector<1x1x8x8xf32>
    %274 = vector.shape_cast %273 : vector<1x1x8x8xf32> to vector<8x8xf32>
    %275 = vector.extract_strided_slice %274 {offsets = [0, 0], sizes = [1, 8], strides = [1, 1]} : vector<8x8xf32> to vector<1x8xf32>
    %c1_207 = arith.constant 1 : index
    %c128_208 = arith.constant 128 : index
    %276 = vector.load %arg5[%c1_207, %c128_208] : memref<2x256xf32, #tpu.memory_space<vmem>>, vector<1x8xf32>
    tpu.vector_store %arg5[%c1_207, %c128_208], %275 {strides = array<i32>} : memref<2x256xf32, #tpu.memory_space<vmem>>, vector<1x8xf32>,
    %277 = vector.extract_strided_slice %274 {offsets = [1, 0], sizes = [1, 8], strides = [1, 1]} : vector<8x8xf32> to vector<1x8xf32>
    %c1_209 = arith.constant 1 : index
    %c136_210 = arith.constant 136 : index
    %278 = vector.load %arg5[%c1_209, %c136_210] : memref<2x256xf32, #tpu.memory_space<vmem>>, vector<1x8xf32>
    tpu.vector_store %arg5[%c1_209, %c136_210], %277 {strides = array<i32>} : memref<2x256xf32, #tpu.memory_space<vmem>>, vector<1x8xf32>,
    %279 = vector.extract_strided_slice %274 {offsets = [2, 0], sizes = [1, 8], strides = [1, 1]} : vector<8x8xf32> to vector<1x8xf32>
    %c1_211 = arith.constant 1 : index
    %c144_212 = arith.constant 144 : index
    %280 = vector.load %arg5[%c1_211, %c144_212] : memref<2x256xf32, #tpu.memory_space<vmem>>, vector<1x8xf32>
    tpu.vector_store %arg5[%c1_211, %c144_212], %279 {strides = array<i32>} : memref<2x256xf32, #tpu.memory_space<vmem>>, vector<1x8xf32>,
    %281 = vector.extract_strided_slice %274 {offsets = [3, 0], sizes = [1, 8], strides = [1, 1]} : vector<8x8xf32> to vector<1x8xf32>
    %c1_213 = arith.constant 1 : index
    %c152_214 = arith.constant 152 : index
    %282 = vector.load %arg5[%c1_213, %c152_214] : memref<2x256xf32, #tpu.memory_space<vmem>>, vector<1x8xf32>
    tpu.vector_store %arg5[%c1_213, %c152_214], %281 {strides = array<i32>} : memref<2x256xf32, #tpu.memory_space<vmem>>, vector<1x8xf32>,
    %283 = vector.extract_strided_slice %274 {offsets = [4, 0], sizes = [1, 8], strides = [1, 1]} : vector<8x8xf32> to vector<1x8xf32>
    %c1_215 = arith.constant 1 : index
    %c160_216 = arith.constant 160 : index
    %284 = vector.load %arg5[%c1_215, %c160_216] : memref<2x256xf32, #tpu.memory_space<vmem>>, vector<1x8xf32>
    tpu.vector_store %arg5[%c1_215, %c160_216], %283 {strides = array<i32>} : memref<2x256xf32, #tpu.memory_space<vmem>>, vector<1x8xf32>,
    %285 = vector.extract_strided_slice %274 {offsets = [5, 0], sizes = [1, 8], strides = [1, 1]} : vector<8x8xf32> to vector<1x8xf32>
    %c1_217 = arith.constant 1 : index
    %c168_218 = arith.constant 168 : index
    %286 = vector.load %arg5[%c1_217, %c168_218] : memref<2x256xf32, #tpu.memory_space<vmem>>, vector<1x8xf32>
    tpu.vector_store %arg5[%c1_217, %c168_218], %285 {strides = array<i32>} : memref<2x256xf32, #tpu.memory_space<vmem>>, vector<1x8xf32>,
    %287 = vector.extract_strided_slice %274 {offsets = [6, 0], sizes = [1, 8], strides = [1, 1]} : vector<8x8xf32> to vector<1x8xf32>
    %c1_219 = arith.constant 1 : index
    %c176_220 = arith.constant 176 : index
    %288 = vector.load %arg5[%c1_219, %c176_220] : memref<2x256xf32, #tpu.memory_space<vmem>>, vector<1x8xf32>
    tpu.vector_store %arg5[%c1_219, %c176_220], %287 {strides = array<i32>} : memref<2x256xf32, #tpu.memory_space<vmem>>, vector<1x8xf32>,
    %289 = vector.extract_strided_slice %274 {offsets = [7, 0], sizes = [1, 8], strides = [1, 1]} : vector<8x8xf32> to vector<1x8xf32>
    %c1_221 = arith.constant 1 : index
    %c184_222 = arith.constant 184 : index
    %290 = vector.load %arg5[%c1_221, %c184_222] : memref<2x256xf32, #tpu.memory_space<vmem>>, vector<1x8xf32>
    tpu.vector_store %arg5[%c1_221, %c184_222], %289 {strides = array<i32>} : memref<2x256xf32, #tpu.memory_space<vmem>>, vector<1x8xf32>,
    %291 = vector.extract_strided_slice %20 {offsets = [1, 3, 0, 0], sizes = [1, 1, 8, 8], strides = [1, 1, 1, 1]} : vector<2x4x8x8xf32> to vector<1x1x8x8xf32>
    %292 = vector.shape_cast %291 : vector<1x1x8x8xf32> to vector<8x8xf32>
    %293 = vector.extract_strided_slice %292 {offsets = [0, 0], sizes = [1, 8], strides = [1, 1]} : vector<8x8xf32> to vector<1x8xf32>
    %c1_223 = arith.constant 1 : index
    %c192_224 = arith.constant 192 : index
    %294 = vector.load %arg5[%c1_223, %c192_224] : memref<2x256xf32, #tpu.memory_space<vmem>>, vector<1x8xf32>
    tpu.vector_store %arg5[%c1_223, %c192_224], %293 {strides = array<i32>} : memref<2x256xf32, #tpu.memory_space<vmem>>, vector<1x8xf32>,
    %295 = vector.extract_strided_slice %292 {offsets = [1, 0], sizes = [1, 8], strides = [1, 1]} : vector<8x8xf32> to vector<1x8xf32>
    %c1_225 = arith.constant 1 : index
    %c200_226 = arith.constant 200 : index
    %296 = vector.load %arg5[%c1_225, %c200_226] : memref<2x256xf32, #tpu.memory_space<vmem>>, vector<1x8xf32>
    tpu.vector_store %arg5[%c1_225, %c200_226], %295 {strides = array<i32>} : memref<2x256xf32, #tpu.memory_space<vmem>>, vector<1x8xf32>,
    %297 = vector.extract_strided_slice %292 {offsets = [2, 0], sizes = [1, 8], strides = [1, 1]} : vector<8x8xf32> to vector<1x8xf32>
    %c1_227 = arith.constant 1 : index
    %c208_228 = arith.constant 208 : index
    %298 = vector.load %arg5[%c1_227, %c208_228] : memref<2x256xf32, #tpu.memory_space<vmem>>, vector<1x8xf32>
    tpu.vector_store %arg5[%c1_227, %c208_228], %297 {strides = array<i32>} : memref<2x256xf32, #tpu.memory_space<vmem>>, vector<1x8xf32>,
    %299 = vector.extract_strided_slice %292 {offsets = [3, 0], sizes = [1, 8], strides = [1, 1]} : vector<8x8xf32> to vector<1x8xf32>
    %c1_229 = arith.constant 1 : index
    %c216_230 = arith.constant 216 : index
    %300 = vector.load %arg5[%c1_229, %c216_230] : memref<2x256xf32, #tpu.memory_space<vmem>>, vector<1x8xf32>
    tpu.vector_store %arg5[%c1_229, %c216_230], %299 {strides = array<i32>} : memref<2x256xf32, #tpu.memory_space<vmem>>, vector<1x8xf32>,
    %301 = vector.extract_strided_slice %292 {offsets = [4, 0], sizes = [1, 8], strides = [1, 1]} : vector<8x8xf32> to vector<1x8xf32>
    %c1_231 = arith.constant 1 : index
    %c224_232 = arith.constant 224 : index
    %302 = vector.load %arg5[%c1_231, %c224_232] : memref<2x256xf32, #tpu.memory_space<vmem>>, vector<1x8xf32>
    tpu.vector_store %arg5[%c1_231, %c224_232], %301 {strides = array<i32>} : memref<2x256xf32, #tpu.memory_space<vmem>>, vector<1x8xf32>,
    %303 = vector.extract_strided_slice %292 {offsets = [5, 0], sizes = [1, 8], strides = [1, 1]} : vector<8x8xf32> to vector<1x8xf32>
    %c1_233 = arith.constant 1 : index
    %c232_234 = arith.constant 232 : index
    %304 = vector.load %arg5[%c1_233, %c232_234] : memref<2x256xf32, #tpu.memory_space<vmem>>, vector<1x8xf32>
    tpu.vector_store %arg5[%c1_233, %c232_234], %303 {strides = array<i32>} : memref<2x256xf32, #tpu.memory_space<vmem>>, vector<1x8xf32>,
    %305 = vector.extract_strided_slice %292 {offsets = [6, 0], sizes = [1, 8], strides = [1, 1]} : vector<8x8xf32> to vector<1x8xf32>
    %c1_235 = arith.constant 1 : index
    %c240_236 = arith.constant 240 : index
    %306 = vector.load %arg5[%c1_235, %c240_236] : memref<2x256xf32, #tpu.memory_space<vmem>>, vector<1x8xf32>
    tpu.vector_store %arg5[%c1_235, %c240_236], %305 {strides = array<i32>} : memref<2x256xf32, #tpu.memory_space<vmem>>, vector<1x8xf32>,
    %307 = vector.extract_strided_slice %292 {offsets = [7, 0], sizes = [1, 8], strides = [1, 1]} : vector<8x8xf32> to vector<1x8xf32>
    %c1_237 = arith.constant 1 : index
    %c248_238 = arith.constant 248 : index
    %308 = vector.load %arg5[%c1_237, %c248_238] : memref<2x256xf32, #tpu.memory_space<vmem>>, vector<1x8xf32>
    tpu.vector_store %arg5[%c1_237, %c248_238], %307 {strides = array<i32>} : memref<2x256xf32, #tpu.memory_space<vmem>>, vector<1x8xf32>,
    return
  }
  func.func @transform_0(%arg0: i32) -> (i32, i32, i32, i32) {
    %c0_i32 = arith.constant 0 : i32
    %c0_i32_0 = arith.constant 0 : i32
    %c0_i32_1 = arith.constant 0 : i32
    %c0_i32_2 = arith.constant 0 : i32
    return %arg0, %c0_i32, %c0_i32_0, %c0_i32_1 : i32, i32, i32, i32
  }
  func.func @transform_1(%arg0: i32) -> (i32, i32, i32, i32) {
    %c0_i32 = arith.constant 0 : i32
    %c0_i32_0 = arith.constant 0 : i32
    %c0_i32_1 = arith.constant 0 : i32
    %c0_i32_2 = arith.constant 0 : i32
    return %arg0, %c0_i32, %c0_i32_0, %c0_i32_1 : i32, i32, i32, i32
  }
  func.func @transform_2(%arg0: i32) -> (i32, i32, i32, i32) {
    %c0_i32 = arith.constant 0 : i32
    %c0_i32_0 = arith.constant 0 : i32
    %c0_i32_1 = arith.constant 0 : i32
    %c0_i32_2 = arith.constant 0 : i32
    return %arg0, %c0_i32, %c0_i32_0, %c0_i32_1 : i32, i32, i32, i32
  }
  func.func @transform_3(%arg0: i32) -> (i32, i32) {
    %c0_i32 = arith.constant 0 : i32
    %c0_i32_0 = arith.constant 0 : i32
    return %arg0, %c0_i32 : i32, i32
  }
  func.func @transform_4(%arg0: i32) -> (i32, i32) {
    %c0_i32 = arith.constant 0 : i32
    %c0_i32_0 = arith.constant 0 : i32
    return %arg0, %c0_i32 : i32, i32
  }
}

</mosaic_0001>

<bundles_post_ra>
// kernel: tpu_custom_call.1
= control target key start
LH: loop header
LB: loop body
LE: loop exit
PB: predicated region body
PF: predicated region fallthrough
CT: control target
= control target key end

     0   :  { %10 = vsyncpa [#allocation3], 0  ;;  %s3281_s0 = inlined_call_operand.hbm [shape: f32[2,4,8,8], index: 0, kind: input, shape index: {}]   ;;  %s3282_s1 = inlined_call_operand.hbm [shape: f32[2,4,8,8], index: 1, kind: input, shape index: {}]   ;;  %s3283_s2 = inlined_call_operand.hbm [shape: f32[2,4,8,8], index: 2, kind: input, shape index: {}]   ;;  %s3284_s3 = inlined_call_operand.hbm [shape: f32[2,256], index: 3, kind: output, shape index: {0}]   ;;  %s3285_s4 = inlined_call_operand.hbm [shape: f32[2,256], index: 4, kind: output, shape index: {1}]  }
   0x1   :  { %11 = vsyncpa [#allocation6], 0 }
   0x2   :  { %12 = vsyncpa [#allocation4], 0 }
   0x3   :  { %13 = vsyncpa [#allocation10], 0  ;;  %s2656_s15 = smov [#allocation5]   ;;  %s2657_s17 = smov [#allocation2]  }
   0x4   :  { %s31_s16 = sshll.u32 %s2656_s15, 4  ;;  %s19_s18 = sshll.u32 %s2657_s17, 4  ;;  %s32_s16 = int_to_ptr.vmem [resolvable:$true] %s31_s16  ;;  %s2705_s18 = int_to_ptr.vmem [resolvable:$true] %s19_s18 }
   0x5   :  { %s2538_s21 = scalar_lea.hbm %s3282_s1, 1024 }
   0x6   :  { %p2539_p0 = scmp.ne.s32.totalorder %s3282_s1, %s2538_s21  ;;  %p2542_p1 = scmp.lt.u32.totalorder %s2538_s21, %s3282_s1 }
   0x8   :  { %p2544_p2 = pnand %p2542_p1, %p2539_p0 }
   0xa   :  { %2547 = shalt.err (!%p2544_p2)
}
   0xb   :  { %s2548_s26 = scalar_lea.vmem %s32_s16, 1024  ;;  %p2553_p4 = scmp.lt.s32.totalorder %s32_s16, %s32_s16 }
   0xc   :  { %p2549_p3 = scmp.ne.s32.totalorder %s32_s16, %s2548_s26  ;;  %p2554_p5 = scmp.lt.s32.totalorder %s2548_s26, %s2548_s26 }
   0xe   :  { %p2555_p6 = por %p2554_p5, %p2553_p4 }
  0x10   :  { %p2556_p7 = pnand %p2555_p6, %p2549_p3 }
  0x12   :  { %2559 = shalt.err (!%p2556_p7)
}
  0x13   :  { %s2658_s27 = smov 128   ;;  %s2659_s28 = smov 8  }
  0x14   :  { %37 = dma.hbm_to_vmem [thread:$0]  %s3282_s1, 1024, %s32_s16, [#allocation6], %s2658_s27, %s2658_s27, %s2659_s28  }
  0x15   :  { %s2560_s7 = scalar_lea.hbm %s3281_s0, 1024 }
  0x16   :  { %p2561_p8 = scmp.ne.s32.totalorder %s3281_s0, %s2560_s7  ;;  %p2564_p9 = scmp.lt.u32.totalorder %s2560_s7, %s3281_s0 }
  0x18   :  { %p2566_p10 = pnand %p2564_p9, %p2561_p8 }
  0x1a   :  { %2569 = shalt.err (!%p2566_p10)
}
  0x1b   :  { %s2570_s12 = scalar_lea.vmem %s2705_s18, 1024  ;;  %p2575_p12 = scmp.lt.s32.totalorder %s2705_s18, %s2705_s18 }
  0x1c   :  { %p2571_p11 = scmp.ne.s32.totalorder %s2705_s18, %s2570_s12  ;;  %p2576_p13 = scmp.lt.s32.totalorder %s2570_s12, %s2570_s12 }
  0x1e   :  { %p2577_p0 = por %p2576_p13, %p2575_p12 }
  0x20   :  { %p2578_p1 = pnand %p2577_p0, %p2571_p11 }
  0x22   :  { %2581 = shalt.err (!%p2578_p1)
}
  0x23   :  { %25 = dma.hbm_to_vmem [thread:$0]  %s3281_s0, 1024, %s2705_s18, [#allocation3], %s2658_s27, %s2658_s27, %s2659_s28  }
  0x24   :  { %s2660_s14 = smov [#allocation7]   ;;  %s2582_s19 = scalar_lea.hbm %s3283_s2, 1024 }
  0x25   :  { %s43_s15 = sshll.u32 %s2660_s14, 4  ;;  %p2583_p2 = scmp.ne.s32.totalorder %s3283_s2, %s2582_s19  ;;  %s44_s15 = int_to_ptr.vmem [resolvable:$true] %s43_s15 }
  0x26   :  { %p2586_p3 = scmp.lt.u32.totalorder %s2582_s19, %s3283_s2 }
  0x28   :  { %p2588_p4 = pnand %p2586_p3, %p2583_p2 }
  0x2a   :  { %2591 = shalt.err (!%p2588_p4)
}
  0x2b   :  { %s2592_s24 = scalar_lea.vmem %s44_s15, 1024  ;;  %p2597_p6 = scmp.lt.s32.totalorder %s44_s15, %s44_s15 }
  0x2c   :  { %p2593_p5 = scmp.ne.s32.totalorder %s44_s15, %s2592_s24  ;;  %p2598_p7 = scmp.lt.s32.totalorder %s2592_s24, %s2592_s24 }
  0x2e   :  { %p2599_p8 = por %p2598_p7, %p2597_p6 }
  0x30   :  { %p2600_p9 = pnand %p2599_p8, %p2593_p5 }
  0x32   :  { %2603 = shalt.err (!%p2600_p9)
}
  0x33   :  { %49 = dma.hbm_to_vmem [thread:$0]  %s3283_s2, 1024, %s44_s15, [#allocation6], %s2658_s27, %s2658_s27, %s2659_s28  }
  0x34   :  { %2648 = dma.done.wait [#allocation3], 1024  }
  0x35   :  { %2649 = vsyncadd [#allocation3], 4294966272 }
  0x36   :  { %2650 = dma.done.wait [#allocation6], 2048  }
  0x37   :  { %2651 = vsyncadd [#allocation6], 4294965248  ;;  %v2661_v0 = vmov 0.0   ;;  %vm2662_vm0 = vmmov 0   ;;  %v75_v1 = vld [vmem:[#allocation5] sm:$0xff]  ;;  %v76_v2 = vld [vmem:[#allocation5 + $0x8] sm:$0xff] }
  0x38   :  { %2402 = vmatprep.subr.mxu0 %v2661_v0  ;;  %2407 = vmatprep.subr.mxu1 %v2661_v0  ;;  %v59_v3 = vld [vmem:[#allocation2] sm:$0xff]  ;;  %vm91_vm1 = vcmask 64512   ;;  %v60_v5 = vld [vmem:[#allocation2 + $0x8] sm:$0xff]  ;;  %v77_v6 = vld [vmem:[#allocation5 + $0x10] sm:$0xff]  ;;  %vm1348_vm2 = vcmask 57344   ;;  %s2664_s2 = smov 64  }
  0x39   :  { %2404 = vmatprep.mubr.msk.f32.mxu0 %vm2662_vm0, %v2661_v0  ;;  %2409 = vmatprep.mubr.msk.f32.mxu1 %vm2662_vm0, %v2661_v0  ;;  %v67_v4 = vmul.f32 0.35355338, %v59_v3  ;;  %v61_v7 = vld [vmem:[#allocation2 + $0x10] sm:$0xff]  ;;  %v68_v8 = vmul.f32 0.35355338, %v60_v5  ;;  %v78_v10 = vld [vmem:[#allocation5 + $0x18] sm:$0xff] }
  0x3a   :  { %2403 = vmatpush3.msra.mxu0 %v75_v1  ;;  %2408 = vmatpush3.msra.mxu1 %v76_v2  ;;  %v69_v9 = vmul.f32 0.35355338, %v61_v7  ;;  %v62_v11 = vld [vmem:[#allocation2 + $0x18] sm:$0xff]  ;;  %v63_v12 = vld [vmem:[#allocation2 + $0x20] sm:$0xff]  ;;  %v64_v15 = vld [vmem:[#allocation2 + $0x28] sm:$0xff]  ;;  %s2665_s25 = smov 72  }
  0x3b   :  { %2412 = vmatprep.subr.mxu0 %v2661_v0  ;;  %2417 = vmatprep.subr.mxu1 %v2661_v0  ;;  %v79_v13 = vld [vmem:[#allocation5 + $0x20] sm:$0xff]  ;;  %v70_v14 = vmul.f32 0.35355338, %v62_v11  ;;  %v71_v16 = vmul.f32 0.35355338, %v63_v12  ;;  %v80_v17 = vld [vmem:[#allocation5 + $0x28] sm:$0xff] }
  0x3c   :  { %2405 = vmatmul.mubr.msk.f32.vlgmr.msra.gmra.mrb[0].mxu0 %vm91_vm1, %v67_v4  ;;  %2410 = vmatmul.mubr.msk.f32.vlgmr.msra.gmra.mrb[0].mxu1 %vm91_vm1, %v68_v8  ;;  %v65_v18 = vld [vmem:[#allocation2 + $0x30] sm:$0xff]  ;;  %v72_v20 = vmul.f32 0.35355338, %v64_v15  ;;  %v66_v21 = vld [vmem:[#allocation2 + $0x38] sm:$0xff]  ;;  %s2666_s26 = smov 16   ;;  %s2667_s27 = smov 24  }
  0x3d   :  { %2413 = vmatpush3.msra.mxu0 %v77_v6  ;;  %2414 = vmatprep.mubr.msk.f32.mxu0 %vm2662_vm0, %v2661_v0  ;;  %v81_v19 = vld [vmem:[#allocation5 + $0x30] sm:$0xff]  ;;  %v73_v22 = vmul.f32 0.35355338, %v65_v18  ;;  %v82_v23 = vld [vmem:[#allocation5 + $0x38] sm:$0xff]  ;;  %v74_v24 = vmul.f32 0.35355338, %v66_v21 }
  0x3e   :  { %2422 = vmatprep.subr.mxu0 %v2661_v0  ;;  %2418 = vmatpush3.msra.mxu1 %v78_v10  ;;  %s2668_s29 = smov 32   ;;  %s2669_s30 = smov 40   ;;  %vm1363_vm3 = vcmask 122944   ;;  %vm1369_vm4 = vcmask 188544   ;;  %vm1376_vm5 = vcmask 254144   ;;  %vm1389_vm6 = vcmask 319744  }
  0x3f   :  { %2419 = vmatprep.mubr.msk.f32.mxu1 %vm2662_vm0, %v2661_v0  ;;  %2427 = vmatprep.subr.mxu1 %v2661_v0  ;;  %s2670_s5 = smov 80   ;;  %s2671_s6 = smov 88   ;;  %vm1396_vm7 = vcmask 385344   ;;  %vm1402_vm8 = vcmask 450944   ;;  %vm1409_vm9 = vcmask 516544   ;;  %vm1422_vm10 = vcmask 582144  }
  0x40   :  { %2415 = vmatmul.mubr.msk.f32.vlgmr.msra.gmra.mrb[2].mxu0 %vm91_vm1, %v69_v9  ;;  %2420 = vmatmul.mubr.msk.f32.vlgmr.msra.gmra.mrb[2].mxu1 %vm91_vm1, %v70_v14  ;;  %s2672_s7 = smov 96   ;;  %s2673_s8 = smov 104   ;;  %vm1429_vm11 = vcmask 647744   ;;  %vm1435_vm12 = vcmask 713344   ;;  %vm1442_vm13 = vcmask 778944   ;;  %vm1455_vm14 = vcmask 844544  }
  0x41   :  { %2423 = vmatpush3.msra.mxu0 %v79_v13  ;;  %2424 = vmatprep.mubr.msk.f32.mxu0 %vm2662_vm0, %v2661_v0  ;;  %s2674_s9 = smov 48   ;;  %s2675_s10 = smov 112   ;;  %vm1462_vm15 = vcmask 910144  }
  0x42   :  { %2432 = vmatprep.subr.mxu0 %v2661_v0  ;;  %2428 = vmatpush3.msra.mxu1 %v80_v17  ;;  %s2676_s11 = smov 56   ;;  %s2677_s12 = smov 120  }
  0x43   :  { %2429 = vmatprep.mubr.msk.f32.mxu1 %vm2662_vm0, %v2661_v0  ;;  %2437 = vmatprep.subr.mxu1 %v2661_v0  ;;  %s2679_s13 = smov [#allocation9]  }
  0x44   :  { %2425 = vmatmul.mubr.msk.f32.vlgmr.msra.gmra.mrb[4].mxu0 %vm91_vm1, %v71_v16  ;;  %2430 = vmatmul.mubr.msk.f32.vlgmr.msra.gmra.mrb[4].mxu1 %vm91_vm1, %v72_v20  ;;  %s2276_s14 = sshll.u32 %s2679_s13, 4  ;;  %s2277_s14 = int_to_ptr.vmem [resolvable:$true] %s2276_s14 }
  0x45   :  { %2433 = vmatpush3.msra.mxu0 %v81_v19  ;;  %2434 = vmatprep.mubr.msk.f32.mxu0 %vm2662_vm0, %v2661_v0 }
  0x46   :  { %2442 = vmatprep.subr.mxu0 %v2661_v0  ;;  %2438 = vmatpush3.msra.mxu1 %v82_v23 }
  0x47   :  { %2439 = vmatprep.mubr.msk.f32.mxu1 %vm2662_vm0, %v2661_v0  ;;  %2447 = vmatprep.subr.mxu1 %v2661_v0 }
  0x48   :  { %2435 = vmatmul.mubr.msk.f32.vlgmr.msra.gmra.mrb[6].mxu0 %vm91_vm1, %v73_v22  ;;  %2440 = vmatmul.mubr.msk.f32.vlgmr.msra.gmra.mrb[6].mxu1 %vm91_vm1, %v74_v24 }
  0x49   :  { %2444 = vmatprep.mubr.msk.f32.mxu0 %vm2662_vm0, %v2661_v0  ;;  %2449 = vmatprep.mubr.msk.f32.mxu1 %vm2662_vm0, %v2661_v0 }
 0x10f   :  { %v161_v25 = vpop.f32.mrb[0].mxu0  ;;  %v234_v26 = vpop.f32.mrb[0].mxu1 }
 0x110   :  { %v2406_v27 = vpop.f32.mrb[1].mxu0  ;;  %v676_v28 = vsel %vm91_vm1, %v161_v25, -inf  ;;  %v679_v29 = vsel %vm91_vm1, %v234_v26, -inf  ;;  %v2411_v30 = vpop.f32.mrb[1].mxu1 }
 0x111   :  { %677 = vmax.xlane.f32.xlu0 %v676_v28  ;;  %680 = vmax.xlane.f32.xlu1 %v679_v29  ;;  %v84_v27 = vld [vmem:[#allocation7 + $0x8] sm:$0xff]  ;;  %v2663_v29 = vmov 1983009808  }
 0x112   :  { %2448 = vmatpush3.msra.mxu1 %v84_v27  ;;  %v1352_v30 = vunpack.c.l.s4 %v2663_v29 }
 0x113   :  { %v307_v31 = vpop.f32.mrb[2].mxu0  ;;  %v380_v34 = vpop.f32.mrb[2].mxu1  ;;  %2457 = vmatprep.subr.mxu1 %v2661_v0 }
 0x114   :  { %v682_v32 = vsel %vm91_vm1, %v307_v31, -inf  ;;  %v2416_v33 = vpop.f32.mrb[3].mxu0  ;;  %v685_v35 = vsel %vm91_vm1, %v380_v34, -inf  ;;  %v2421_v36 = vpop.f32.mrb[3].mxu1 }
 0x115   :  { %683 = vmax.xlane.f32.xlu0 %v682_v32 }
 0x117   :  { %v453_v37 = vpop.f32.mrb[4].mxu0  ;;  %v526_v40 = vpop.f32.mrb[4].mxu1 }
 0x118   :  { %v688_v38 = vsel %vm91_vm1, %v453_v37, -inf  ;;  %v2426_v39 = vpop.f32.mrb[5].mxu0  ;;  %v691_v41 = vsel %vm91_vm1, %v526_v40, -inf  ;;  %v2431_v42 = vpop.f32.mrb[5].mxu1 }
 0x119   :  { %686 = vmax.xlane.f32.xlu0 %v685_v35  ;;  %689 = vmax.xlane.f32.xlu1 %v688_v38  ;;  %v85_v42 = vld [vmem:[#allocation7 + $0x10] sm:$0xff] }
 0x11b   :  { %v599_v43 = vpop.f32.mrb[6].mxu0  ;;  %v672_v46 = vpop.f32.mrb[6].mxu1 }
 0x11c   :  { %v694_v44 = vsel %vm91_vm1, %v599_v43, -inf  ;;  %v2436_v45 = vpop.f32.mrb[7].mxu0  ;;  %v697_v47 = vsel %vm91_vm1, %v672_v46, -inf  ;;  %v2441_v48 = vpop.f32.mrb[7].mxu1 }
 0x11d   :  { %692 = vmax.xlane.f32.xlu0 %v691_v41  ;;  %695 = vmax.xlane.f32.xlu1 %v694_v44 }
 0x121   :  { %698 = vmax.xlane.f32.xlu1 %v697_v47 }
 0x19e   :  { %v678_v49 = vpop.xlane.xlu0 %677  ;;  %v681_v50 = vpop.xlane.xlu1 %680 }
 0x19f   :  { %v700_v51 = vsub.f32 %v161_v25, %v678_v49  ;;  %v701_v52 = vsub.f32 %v234_v26, %v681_v50  ;;  %v83_v26 = vld [vmem:[#allocation7] sm:$0xff]  ;;  %v86_v49 = vld [vmem:[#allocation7 + $0x18] sm:$0xff] }
 0x1a0   :  { %2443 = vmatpush3.msra.mxu0 %v83_v26 }
 0x1a1   :  { %v708_v53 = vmul.f32 1.442695, %v700_v51  ;;  %v710_v54 = vmul.f32 1.442695, %v701_v52  ;;  %2452 = vmatprep.subr.mxu0 %v2661_v0 }
 0x1a2   :  { %v684_v55 = vpop.xlane.xlu0 %683 }
 0x1a3   :  { %2506 = vpow2.f32 %v708_v53  ;;  %v702_v56 = vsub.f32 %v307_v31, %v684_v55  ;;  %v1354_v31 = vlaneseq  ;;  %v87_v53 = vld [vmem:[#allocation7 + $0x20] sm:$0xff] }
 0x1a4   :  { %2508 = vpow2.f32 %v710_v54 }
 0x1a5   :  { %v712_v57 = vmul.f32 1.442695, %v702_v56  ;;  %v1355_v35 = vshrl.u32 %v1354_v31, 7 }
 0x1a6   :  { %v687_v58 = vpop.xlane.xlu0 %686  ;;  %v690_v59 = vpop.xlane.xlu1 %689 }
 0x1a7   :  { %2510 = vpow2.f32 %v712_v57  ;;  %v703_v60 = vsub.f32 %v380_v34, %v687_v58  ;;  %v704_v61 = vsub.f32 %v453_v37, %v690_v59  ;;  %v1353_v34 = vunpack.c.0.s8 %v1352_v30 }
 0x1a9   :  { %v714_v62 = vmul.f32 1.442695, %v703_v60  ;;  %v716_v63 = vmul.f32 1.442695, %v704_v61  ;;  %v2834_v38 = vsub.s32 %v1353_v34, %v1355_v35  ;;  %v88_v61 = vld [vmem:[#allocation7 + $0x28] sm:$0xff] }
 0x1aa   :  { %v693_v1 = vpop.xlane.xlu0 %692  ;;  %v696_v2 = vpop.xlane.xlu1 %695 }
 0x1ab   :  { %2512 = vpow2.f32 %v714_v62  ;;  %v705_v3 = vsub.f32 %v526_v40, %v693_v1  ;;  %v706_v4 = vsub.f32 %v599_v43, %v696_v2 }
 0x1ac   :  { %2514 = vpow2.f32 %v716_v63  ;;  %v89_v63 = vld [vmem:[#allocation7 + $0x30] sm:$0xff] }
 0x1ad   :  { %v2507_v5 = vpop.eup %2506  ;;  %v718_v6 = vmul.f32 1.442695, %v705_v3  ;;  %v720_v7 = vmul.f32 1.442695, %v706_v4 }
 0x1ae   :  { %v699_v8 = vpop.xlane.xlu1 %698  ;;  %v724_v9 = vsel %vm91_vm1, %v2507_v5, 0.0  ;;  %v2804_v10 = vpop.eup %2508 }
 0x1af   :  { %2516 = vpow2.f32 %v718_v6  ;;  %v707_v11 = vsub.f32 %v672_v46, %v699_v8  ;;  %725 = vadd.xlane.f32.xlu0 %v724_v9  ;;  %v727_v14 = vsel %vm91_vm1, %v2804_v10, 0.0  ;;  %v90_v6 = vld [vmem:[#allocation7 + $0x38] sm:$0xff] }
 0x1b0   :  { %2518 = vpow2.f32 %v720_v7 }
 0x1b1   :  { %v2806_v12 = vpop.eup %2510  ;;  %v722_v13 = vmul.f32 1.442695, %v707_v11 }
 0x1b2   :  { %v730_v15 = vsel %vm91_vm1, %v2806_v12, 0.0 }
 0x1b3   :  { %2520 = vpow2.f32 %v722_v13  ;;  %728 = vadd.xlane.f32.xlu0 %v727_v14  ;;  %731 = vadd.xlane.f32.xlu1 %v730_v15 }
 0x1b5   :  { %v2812_v16 = vpop.eup %2512 }
 0x1b6   :  { %v2814_v17 = vpop.eup %2514  ;;  %v733_v18 = vsel %vm91_vm1, %v2812_v16, 0.0 }
 0x1b7   :  { %734 = vadd.xlane.f32.xlu0 %v733_v18  ;;  %v736_v19 = vsel %vm91_vm1, %v2814_v17, 0.0 }
 0x1b8   :  { %737 = vadd.xlane.f32.xlu1 %v736_v19 }
 0x1b9   :  { %v2820_v20 = vpop.eup %2516 }
 0x1ba   :  { %v2822_v21 = vpop.eup %2518  ;;  %v739_v22 = vsel %vm91_vm1, %v2820_v20, 0.0 }
 0x1bb   :  { %740 = vadd.xlane.f32.xlu0 %v739_v22  ;;  %v742_v23 = vsel %vm91_vm1, %v2822_v21, 0.0 }
 0x1bc   :  { %743 = vadd.xlane.f32.xlu1 %v742_v23 }
 0x1bd   :  { %v2828_v24 = vpop.eup %2520 }
 0x1be   :  { %v745_v25 = vsel %vm91_vm1, %v2828_v24, 0.0 }
 0x1c0   :  { %746 = vadd.xlane.f32.xlu1 %v745_v25 }
 0x23c   :  { %v726_v28 = vpop.xlane.xlu0 %725 }
 0x23d   :  { %2522 = vrcp.f32 %v726_v28 }
 0x240   :  { %v729_v32 = vpop.xlane.xlu0 %728  ;;  %v732_v33 = vpop.xlane.xlu1 %731 }
 0x241   :  { %2524 = vrcp.f32 %v729_v32 }
 0x242   :  { %2526 = vrcp.f32 %v732_v33 }
 0x244   :  { %v735_v36 = vpop.xlane.xlu0 %734 }
 0x245   :  { %2528 = vrcp.f32 %v735_v36  ;;  %v738_v37 = vpop.xlane.xlu1 %737 }
 0x246   :  { %2530 = vrcp.f32 %v738_v37 }
 0x247   :  { %v2523_v39 = vpop.eup %2522 }
 0x248   :  { %v741_v40 = vpop.xlane.xlu0 %740  ;;  %v749_v41 = vmul.f32 %v2523_v39, %v2507_v5 }
 0x249   :  { %2532 = vrcp.f32 %v741_v40  ;;  %v744_v43 = vpop.xlane.xlu1 %743 }
 0x24a   :  { %2534 = vrcp.f32 %v744_v43  ;;  %2445 = vmatmul.mubr.msk.f32.vlgmr.msra.gmra.mrb[8].mxu0 %vm91_vm1, %v749_v41  ;;  %v1823_v44 = vrot.slane %v749_v41, %v2834_v38  ;;  %1816 = vst.msk [vmem:[#allocation9] sm:$0x1] %vm1348_vm2, %v749_v41  ;;  %v1841_v60 = vcombine.high %v749_v41, %v749_v41 }
 0x24b   :  { %v2525_v45 = vpop.eup %2524  ;;  %2453 = vmatpush3.msra.mxu0 %v85_v42  ;;  %2454 = vmatprep.mubr.msk.f32.mxu0 %vm2662_vm0, %v2661_v0 }
 0x24c   :  { %v2527_v46 = vpop.eup %2526  ;;  %v2338_v47 = vrot.slane %v1823_v44, 9  ;;  %v2842_v48 = vmul.f32 %v2525_v45, %v2804_v10  ;;  %2462 = vmatprep.subr.mxu0 %v2661_v0  ;;  %v1830_v59 = vcombine.high %v1823_v44, %v1823_v44  ;;  %v1848_v5 = vrot.slane %v1841_v60, %v2834_v38 }
 0x24d   :  { %v747_v50 = vpop.xlane.xlu1 %746  ;;  %v2846_v51 = vmul.f32 %v2527_v46, %v2806_v12 }
 0x24e   :  { %2536 = vrcp.f32 %v747_v50  ;;  %1826 = vrot.lane.b32.xlu0 %v2338_v47, %s2659_s28  ;;  %2450 = vmatmul.mubr.msk.f32.vlgmr.msra.gmra.mrb[8].mxu1 %vm91_vm1, %v2842_v48  ;;  %v1876_v52 = vrot.slane %v2842_v48, %v2834_v38  ;;  %v2339_v3 = vrot.slane %v1830_v59, 9  ;;  %v2340_v8 = vrot.slane %v1848_v5, 9 }
 0x24f   :  { %v2529_v54 = vpop.eup %2528  ;;  %2455 = vmatmul.mubr.msk.f32.vlgmr.msra.gmra.mrb[10].mxu0 %vm91_vm1, %v2846_v51  ;;  %2458 = vmatpush3.msra.mxu1 %v86_v49  ;;  %1927 = vst.msk [vmem:[#allocation9 + $0x2] sm:$0x1] %vm1348_vm2, %v2846_v51  ;;  %v1898_v11 = vcombine.high %v2842_v48, %v2842_v48  ;;  %v1952_v23 = vcombine.high %v2846_v51, %v2846_v51 }
 0x250   :  { %v2531_v55 = vpop.eup %2530  ;;  %1877 = vrot.lane.b32.xlu1 %v1876_v52, %s2664_s2  ;;  %2459 = vmatprep.mubr.msk.f32.mxu1 %vm2662_vm0, %v2661_v0  ;;  %v2342_v56 = vrot.slane %v1876_v52, 9  ;;  %v2861_v57 = vmul.f32 %v2529_v54, %v2812_v16  ;;  %v1887_v10 = vcombine.high %v1876_v52, %v1876_v52 }
 0x251   :  { %2463 = vmatpush3.msra.mxu0 %v87_v53  ;;  %2464 = vmatprep.mubr.msk.f32.mxu0 %vm2662_vm0, %v2661_v0  ;;  %v2866_v58 = vmul.f32 %v2531_v55, %v2814_v17  ;;  %v1905_v13 = vrot.slane %v1898_v11, %v2834_v38  ;;  %v1934_v17 = vrot.slane %v2846_v51, %v2834_v38 }
 0x252   :  { %1883 = vrot.lane.b32.xlu0 %v2342_v56, %s2665_s25  ;;  %2460 = vmatmul.mubr.msk.f32.vlgmr.msra.gmra.mrb[10].mxu1 %vm91_vm1, %v2861_v57  ;;  %v2343_v12 = vrot.slane %v1887_v10, 9  ;;  %v1987_v15 = vrot.slane %v2861_v57, %v2834_v38  ;;  %v1959_v25 = vrot.slane %v1952_v23, %v2834_v38  ;;  %v2009_v28 = vcombine.high %v2861_v57, %v2861_v57 }
 0x253   :  { %v2533_v62 = vpop.eup %2532  ;;  %2465 = vmatmul.mubr.msk.f32.vlgmr.msra.gmra.mrb[12].mxu0 %vm91_vm1, %v2866_v58  ;;  %2467 = vmatprep.subr.mxu1 %v2661_v0  ;;  %2038 = vst.msk [vmem:[#allocation9 + $0x1] sm:$0x1] %vm1348_vm2, %v2866_v58  ;;  %v2344_v14 = vrot.slane %v1905_v13, 9  ;;  %v1916_v16 = vcombine.high %v1905_v13, %v1905_v13  ;;  %v2346_v19 = vrot.slane %v1934_v17, 9  ;;  %v1941_v22 = vcombine.high %v1934_v17, %v1934_v17 }
 0x254   :  { %v2535_v1 = vpop.eup %2534  ;;  %1831 = vrot.lane.b32.xlu1 %v1830_v59, %s2666_s26  ;;  %2472 = vmatprep.subr.mxu0 %v2661_v0  ;;  %v2879_v2 = vmul.f32 %v2533_v62, %v2820_v20  ;;  %v2348_v26 = vrot.slane %v1959_v25, 9  ;;  %v1998_v27 = vcombine.high %v1987_v15, %v1987_v15  ;;  %v2016_v30 = vrot.slane %v2009_v28, %v2834_v38 }
 0x255   :  { %2468 = vmatpush3.msra.mxu1 %v88_v61  ;;  %2469 = vmatprep.mubr.msk.f32.mxu1 %vm2662_vm0, %v2661_v0  ;;  %v2884_v4 = vmul.f32 %v2535_v1, %v2822_v21  ;;  %v2345_v20 = vrot.slane %v1916_v16, 9  ;;  %v2350_v21 = vrot.slane %v1987_v15, 9  ;;  %v1970_v32 = vcombine.high %v1959_v25, %v1959_v25 }
 0x256   :  { %2473 = vmatpush3.msra.mxu0 %v89_v63  ;;  %2474 = vmatprep.mubr.msk.f32.mxu0 %vm2662_vm0, %v2661_v0  ;;  %v2351_v29 = vrot.slane %v1998_v27, 9  ;;  %v2352_v31 = vrot.slane %v2016_v30, 9  ;;  %v2098_v34 = vrot.slane %v2879_v2, %v2834_v38  ;;  %v2120_v36 = vcombine.high %v2879_v2, %v2879_v2 }
 0x257   :  { %1837 = vrot.lane.b32.xlu0 %v2339_v3, %s2667_s27  ;;  %2470 = vmatmul.mubr.msk.f32.vlgmr.msra.gmra.mrb[12].mxu1 %vm91_vm1, %v2879_v2  ;;  %2149 = vst.msk [vmem:[#allocation9 + $0x3] sm:$0x1] %vm1348_vm2, %v2884_v4  ;;  %v2349_v33 = vrot.slane %v1970_v32, 9  ;;  %v2946_v37 = vcombine.high %v2016_v30, %v2016_v30  ;;  %v2045_v39 = vrot.slane %v2866_v58, %v2834_v38 }
 0x258   :  { %v2537_v7 = vpop.eup %2536  ;;  %2475 = vmatmul.mubr.msk.f32.vlgmr.msra.gmra.mrb[14].mxu0 %vm91_vm1, %v2884_v4  ;;  %2477 = vmatprep.subr.mxu1 %v2661_v0  ;;  %v2109_v35 = vcombine.high %v2098_v34, %v2098_v34  ;;  %v2127_v40 = vrot.slane %v2120_v36, %v2834_v38  ;;  %v2063_v44 = vcombine.high %v2866_v58, %v2866_v58  ;;  %v2358_v49 = vrot.slane %v2098_v34, 9 }
 0x259   :  { %1849 = vrot.lane.b32.xlu1 %v1848_v5, %s2668_s29  ;;  %2478 = vmatpush3.msra.mxu1 %v90_v6  ;;  %v2899_v9 = vmul.f32 %v2537_v7, %v2828_v24  ;;  %v2347_v24 = vrot.slane %v1941_v22, 9  ;;  %v2354_v41 = vrot.slane %v2045_v39, 9  ;;  %v2052_v43 = vcombine.high %v2045_v39, %v2045_v39 }
 0x25a   :  { %2479 = vmatprep.mubr.msk.f32.mxu1 %vm2662_vm0, %v2661_v0  ;;  %v1859_v0 = vcombine.high %v1848_v5, %v1848_v5  ;;  %v2961_v45 = vcombine.high %v2127_v40, %v2127_v40  ;;  %v2156_v46 = vrot.slane %v2884_v4, %v2834_v38  ;;  %v2070_v47 = vrot.slane %v2063_v44, %v2834_v38 }
 0x25b   :  { %1855 = vrot.lane.b32.xlu0 %v2340_v8, %s2669_s30  ;;  %2480 = vmatmul.mubr.msk.f32.vlgmr.msra.gmra.mrb[14].mxu1 %vm91_vm1, %v2899_v9  ;;  %v2209_v42 = vrot.slane %v2899_v9, %v2834_v38  ;;  %v2174_v51 = vcombine.high %v2884_v4, %v2884_v4  ;;  %v2355_v52 = vrot.slane %v2052_v43, 9  ;;  %v2359_v58 = vrot.slane %v2109_v35, 9 }
 0x25c   :  { %v2341_v18 = vrot.slane %v1859_v0, 9  ;;  %v2362_v48 = vrot.slane %v2156_v46, 9  ;;  %v2163_v50 = vcombine.high %v2156_v46, %v2156_v46  ;;  %v2356_v54 = vrot.slane %v2070_v47, 9 }
 0x25d   :  { %1888 = vrot.lane.b32.xlu1 %v1887_v10, %s2670_s5  ;;  %v2181_v53 = vrot.slane %v2174_v51, %v2834_v38  ;;  %v2366_v55 = vrot.slane %v2209_v42, 9  ;;  %v2081_v56 = vcombine.high %v2070_v47, %v2070_v47  ;;  %v2360_v60 = vrot.slane %v2127_v40, 9 }
 0x25e   :  { %v2363_v57 = vrot.slane %v2163_v50, 9  ;;  %v2220_v62 = vcombine.high %v2209_v42, %v2209_v42  ;;  %v2231_v63 = vcombine.high %v2899_v9, %v2899_v9  ;;  %vm1468_vm0 = vcmask 975744  }
 0x25f   :  { %1894 = vrot.lane.b32.xlu0 %v2343_v12, %s2671_s6  ;;  %v2364_v59 = vrot.slane %v2181_v53, 9  ;;  %v2192_v61 = vcombine.high %v2181_v53, %v2181_v53  ;;  %v2357_v1 = vrot.slane %v2081_v56, 9  ;;  %vm1475_vm1 = vcmask 1041344  }
 0x260   :  { %v2367_v2 = vrot.slane %v2220_v62, 9  ;;  %v2989_v3 = vrot.slane %v2231_v63, %v2834_v38 }
 0x261   :  { %1906 = vrot.lane.b32.xlu1 %v1905_v13, %s2672_s7  ;;  %v2365_v5 = vrot.slane %v2192_v61, 9 }
 0x262   :  { %v2368_v4 = vrot.slane %v2989_v3, 9 }
 0x263   :  { %1912 = vrot.lane.b32.xlu0 %v2344_v14, %s2673_s8 }
 0x265   :  { %1860 = vrot.lane.b32.xlu1 %v1859_v0, %s2674_s9 }
 0x267   :  { %1988 = vrot.lane.b32.xlu0 %v1987_v15, %s2664_s2 }
 0x269   :  { %1917 = vrot.lane.b32.xlu1 %v1916_v16, %s2675_s10 }
 0x26b   :  { %1866 = vrot.lane.b32.xlu0 %v2341_v18, %s2676_s11 }
 0x26d   :  { %1937 = vrot.lane.b32.xlu1 %v2346_v19, %s2659_s28 }
 0x26f   :  { %1923 = vrot.lane.b32.xlu0 %v2345_v20, %s2677_s12 }
 0x271   :  { %1994 = vrot.lane.b32.xlu1 %v2350_v21, %s2665_s25 }
 0x273   :  { %1942 = vrot.lane.b32.xlu0 %v1941_v22, %s2666_s26 }
 0x275   :  { %1948 = vrot.lane.b32.xlu1 %v2347_v24, %s2667_s27 }
 0x277   :  { %1960 = vrot.lane.b32.xlu0 %v1959_v25, %s2668_s29 }
 0x279   :  { %1966 = vrot.lane.b32.xlu1 %v2348_v26, %s2669_s30 }
 0x27b   :  { %1999 = vrot.lane.b32.xlu0 %v1998_v27, %s2670_s5 }
 0x27d   :  { %2005 = vrot.lane.b32.xlu1 %v2351_v29, %s2671_s6 }
 0x27f   :  { %2017 = vrot.lane.b32.xlu0 %v2016_v30, %s2672_s7 }
 0x281   :  { %2023 = vrot.lane.b32.xlu1 %v2352_v31, %s2673_s8 }
 0x283   :  { %1971 = vrot.lane.b32.xlu0 %v1970_v32, %s2674_s9 }
 0x285   :  { %1977 = vrot.lane.b32.xlu1 %v2349_v33, %s2676_s11 }
 0x287   :  { %2099 = vrot.lane.b32.xlu0 %v2098_v34, %s2664_s2 }
 0x289   :  { %2110 = vrot.lane.b32.xlu1 %v2109_v35, %s2670_s5 }
 0x28b   :  { %2028 = vrot.lane.b32.xlu0 %v2946_v37, %s2675_s10 }
 0x28d   :  { %2128 = vrot.lane.b32.xlu1 %v2127_v40, %s2672_s7 }
 0x28f   :  { %2048 = vrot.lane.b32.xlu0 %v2354_v41, %s2659_s28 }
 0x291   :  { %2210 = vrot.lane.b32.xlu1 %v2209_v42, %s2664_s2 }
 0x293   :  { %2053 = vrot.lane.b32.xlu0 %v2052_v43, %s2666_s26 }
 0x295   :  { %2139 = vrot.lane.b32.xlu1 %v2961_v45, %s2675_s10 }
 0x297   :  { %2071 = vrot.lane.b32.xlu0 %v2070_v47, %s2668_s29 }
 0x299   :  { %2159 = vrot.lane.b32.xlu1 %v2362_v48, %s2659_s28 }
 0x29b   :  { %2105 = vrot.lane.b32.xlu0 %v2358_v49, %s2665_s25 }
 0x29d   :  { %2164 = vrot.lane.b32.xlu1 %v2163_v50, %s2666_s26 }
 0x29f   :  { %2059 = vrot.lane.b32.xlu0 %v2355_v52, %s2667_s27 }
 0x2a1   :  { %2182 = vrot.lane.b32.xlu1 %v2181_v53, %s2668_s29 }
 0x2a3   :  { %2077 = vrot.lane.b32.xlu0 %v2356_v54, %s2669_s30 }
 0x2a5   :  { %2216 = vrot.lane.b32.xlu1 %v2366_v55, %s2665_s25 }
 0x2a7   :  { %2082 = vrot.lane.b32.xlu0 %v2081_v56, %s2674_s9 }
 0x2a9   :  { %2170 = vrot.lane.b32.xlu1 %v2363_v57, %s2667_s27 }
 0x2ab   :  { %2116 = vrot.lane.b32.xlu0 %v2359_v58, %s2671_s6 }
 0x2ad   :  { %2188 = vrot.lane.b32.xlu1 %v2364_v59, %s2669_s30 }
 0x2af   :  { %2134 = vrot.lane.b32.xlu0 %v2360_v60, %s2673_s8 }
 0x2b1   :  { %2193 = vrot.lane.b32.xlu1 %v2192_v61, %s2674_s9 }
 0x2b3   :  { %2088 = vrot.lane.b32.xlu0 %v2357_v1, %s2676_s11 }
 0x2b5   :  { %2227 = vrot.lane.b32.xlu1 %v2367_v2, %s2671_s6 }
 0x2b7   :  { %2221 = vrot.lane.b32.xlu0 %v2220_v62, %s2670_s5 }
 0x2b9   :  { %2245 = vrot.lane.b32.xlu1 %v2368_v4, %s2673_s8 }
 0x2bb   :  { %2239 = vrot.lane.b32.xlu0 %v2989_v3, %s2672_s7 }
 0x2bd   :  { %2199 = vrot.lane.b32.xlu1 %v2365_v5, %s2676_s11 }
 0x2c0   :  { %v1827_v6 = vpop.permute.xlu0 %1826 }
 0x2c1   :  { %1829 = vst.msk [vmem:[#allocation9] sm:$0x1] %vm1363_vm3, %v1827_v6 }
 0x2c2   :  { %v1878_v7 = vpop.permute.xlu1 %1877 }
 0x2c4   :  { %v1884_v8 = vpop.permute.xlu0 %1883 }
 0x2c6   :  { %v1832_v9 = vpop.permute.xlu1 %1831 }
 0x2c7   :  { %1834 = vst.msk [vmem:[#allocation9] sm:$0x1] %vm1369_vm4, %v1832_v9 }
 0x2c9   :  { %v1838_v10 = vpop.permute.xlu0 %1837 }
 0x2ca   :  { %1840 = vst.msk [vmem:[#allocation9] sm:$0x1] %vm1376_vm5, %v1838_v10 }
 0x2cb   :  { %v1850_v11 = vpop.permute.xlu1 %1849 }
 0x2cc   :  { %1852 = vst.msk [vmem:[#allocation9] sm:$0x1] %vm1389_vm6, %v1850_v11 }
 0x2cd   :  { %v1856_v12 = vpop.permute.xlu0 %1855 }
 0x2ce   :  { %1858 = vst.msk [vmem:[#allocation9] sm:$0x1] %vm1396_vm7, %v1856_v12 }
 0x2cf   :  { %v1889_v13 = vpop.permute.xlu1 %1888 }
 0x2d1   :  { %v1895_v14 = vpop.permute.xlu0 %1894 }
 0x2d3   :  { %v1907_v0 = vpop.permute.xlu1 %1906 }
 0x2d5   :  { %v1913_v15 = vpop.permute.xlu0 %1912 }
 0x2d7   :  { %v1861_v16 = vpop.permute.xlu1 %1860 }
 0x2d8   :  { %1863 = vst.msk [vmem:[#allocation9] sm:$0x1] %vm1402_vm8, %v1861_v16 }
 0x2d9   :  { %v1989_v17 = vpop.permute.xlu0 %1988 }
 0x2db   :  { %v1918_v18 = vpop.permute.xlu1 %1917 }
 0x2dd   :  { %v1867_v19 = vpop.permute.xlu0 %1866 }
 0x2de   :  { %1869 = vst.msk [vmem:[#allocation9] sm:$0x1] %vm1409_vm9, %v1867_v19 }
 0x2df   :  { %1880 = vst.msk [vmem:[#allocation9] sm:$0x1] %vm1422_vm10, %v1878_v7  ;;  %v1938_v20 = vpop.permute.xlu1 %1937 }
 0x2e0   :  { %1886 = vst.msk [vmem:[#allocation9] sm:$0x1] %vm1429_vm11, %v1884_v8 }
 0x2e1   :  { %1940 = vst.msk [vmem:[#allocation9 + $0x2] sm:$0x1] %vm1363_vm3, %v1938_v20  ;;  %v1924_v21 = vpop.permute.xlu0 %1923 }
 0x2e2   :  { %1891 = vst.msk [vmem:[#allocation9] sm:$0x1] %vm1435_vm12, %v1889_v13 }
 0x2e3   :  { %1897 = vst.msk [vmem:[#allocation9] sm:$0x1] %vm1442_vm13, %v1895_v14  ;;  %v1995_v22 = vpop.permute.xlu1 %1994 }
 0x2e4   :  { %1909 = vst.msk [vmem:[#allocation9] sm:$0x1] %vm1455_vm14, %v1907_v0 }
 0x2e5   :  { %1915 = vst.msk [vmem:[#allocation9] sm:$0x1] %vm1462_vm15, %v1913_v15  ;;  %v1943_v23 = vpop.permute.xlu0 %1942 }
 0x2e6   :  { %1920 = vst.msk [vmem:[#allocation9] sm:$0x1] %vm1468_vm0, %v1918_v18 }
 0x2e7   :  { %1926 = vst.msk [vmem:[#allocation9] sm:$0x1] %vm1475_vm1, %v1924_v21  ;;  %v1949_v24 = vpop.permute.xlu1 %1948 }
 0x2e8   :  { %1945 = vst.msk [vmem:[#allocation9 + $0x2] sm:$0x1] %vm1369_vm4, %v1943_v23 }
 0x2e9   :  { %1951 = vst.msk [vmem:[#allocation9 + $0x2] sm:$0x1] %vm1376_vm5, %v1949_v24  ;;  %v1961_v25 = vpop.permute.xlu0 %1960 }
 0x2ea   :  { %1963 = vst.msk [vmem:[#allocation9 + $0x2] sm:$0x1] %vm1389_vm6, %v1961_v25 }
 0x2eb   :  { %v1967_v26 = vpop.permute.xlu1 %1966 }
 0x2ec   :  { %1969 = vst.msk [vmem:[#allocation9 + $0x2] sm:$0x1] %vm1396_vm7, %v1967_v26 }
 0x2ed   :  { %v2000_v27 = vpop.permute.xlu0 %1999 }
 0x2ef   :  { %v2006_v28 = vpop.permute.xlu1 %2005 }
 0x2f1   :  { %v2018_v29 = vpop.permute.xlu0 %2017 }
 0x2f3   :  { %v2024_v30 = vpop.permute.xlu1 %2023 }
 0x2f5   :  { %v1972_v31 = vpop.permute.xlu0 %1971 }
 0x2f6   :  { %1974 = vst.msk [vmem:[#allocation9 + $0x2] sm:$0x1] %vm1402_vm8, %v1972_v31 }
 0x2f7   :  { %v1978_v32 = vpop.permute.xlu1 %1977 }
 0x2f8   :  { %1980 = vst.msk [vmem:[#allocation9 + $0x2] sm:$0x1] %vm1409_vm9, %v1978_v32 }
 0x2f9   :  { %1991 = vst.msk [vmem:[#allocation9 + $0x2] sm:$0x1] %vm1422_vm10, %v1989_v17  ;;  %v3021_v33 = vpop.permute.xlu0 %2099 }
 0x2fa   :  { %1997 = vst.msk [vmem:[#allocation9 + $0x2] sm:$0x1] %vm1429_vm11, %v1995_v22 }
 0x2fb   :  { %2002 = vst.msk [vmem:[#allocation9 + $0x2] sm:$0x1] %vm1435_vm12, %v2000_v27  ;;  %v3025_v34 = vpop.permute.xlu1 %2110 }
 0x2fc   :  { %2008 = vst.msk [vmem:[#allocation9 + $0x2] sm:$0x1] %vm1442_vm13, %v2006_v28 }
 0x2fd   :  { %2020 = vst.msk [vmem:[#allocation9 + $0x2] sm:$0x1] %vm1455_vm14, %v2018_v29  ;;  %v2029_v35 = vpop.permute.xlu0 %2028 }
 0x2fe   :  { %2026 = vst.msk [vmem:[#allocation9 + $0x2] sm:$0x1] %vm1462_vm15, %v2024_v30 }
 0x2ff   :  { %2031 = vst.msk [vmem:[#allocation9 + $0x2] sm:$0x1] %vm1468_vm0, %v2029_v35  ;;  %v3031_v36 = vpop.permute.xlu1 %2128 }
 0x301   :  { %v2049_v39 = vpop.permute.xlu0 %2048 }
 0x302   :  { %2051 = vst.msk [vmem:[#allocation9 + $0x1] sm:$0x1] %vm1363_vm3, %v2049_v39 }
 0x303   :  { %v3034_v40 = vpop.permute.xlu1 %2210 }
 0x305   :  { %v2054_v41 = vpop.permute.xlu0 %2053 }
 0x306   :  { %2056 = vst.msk [vmem:[#allocation9 + $0x1] sm:$0x1] %vm1369_vm4, %v2054_v41 }
 0x307   :  { %v3037_v42 = vpop.permute.xlu1 %2139 }
 0x309   :  { %v2072_v43 = vpop.permute.xlu0 %2071 }
 0x30b   :  { %v2160_v44 = vpop.permute.xlu1 %2159 }
 0x30c   :  { %2162 = vst.msk [vmem:[#allocation9 + $0x3] sm:$0x1] %vm1363_vm3, %v2160_v44 }
 0x30d   :  { %v2106_v46 = vpop.permute.xlu0 %2105 }
 0x30f   :  { %v2165_v47 = vpop.permute.xlu1 %2164 }
 0x310   :  { %2167 = vst.msk [vmem:[#allocation9 + $0x3] sm:$0x1] %vm1369_vm4, %v2165_v47 }
 0x311   :  { %v2060_v48 = vpop.permute.xlu0 %2059 }
 0x312   :  { %2062 = vst.msk [vmem:[#allocation9 + $0x1] sm:$0x1] %vm1376_vm5, %v2060_v48 }
 0x313   :  { %2074 = vst.msk [vmem:[#allocation9 + $0x1] sm:$0x1] %vm1389_vm6, %v2072_v43  ;;  %v2183_v49 = vpop.permute.xlu1 %2182 }
 0x315   :  { %v2078_v50 = vpop.permute.xlu0 %2077 }
 0x316   :  { %2080 = vst.msk [vmem:[#allocation9 + $0x1] sm:$0x1] %vm1396_vm7, %v2078_v50 }
 0x317   :  { %v3044_v51 = vpop.permute.xlu1 %2216 }
 0x319   :  { %v2083_v52 = vpop.permute.xlu0 %2082 }
 0x31a   :  { %2085 = vst.msk [vmem:[#allocation9 + $0x1] sm:$0x1] %vm1402_vm8, %v2083_v52 }
 0x31b   :  { %v2171_v53 = vpop.permute.xlu1 %2170 }
 0x31c   :  { %2173 = vst.msk [vmem:[#allocation9 + $0x3] sm:$0x1] %vm1376_vm5, %v2171_v53 }
 0x31d   :  { %2185 = vst.msk [vmem:[#allocation9 + $0x3] sm:$0x1] %vm1389_vm6, %v2183_v49  ;;  %v2117_v54 = vpop.permute.xlu0 %2116  ;;  %v833_v55 = vpop.f32.mrb[8].mxu0 }
 0x31e   :  { %1349 = vst.msk [vmem:[#allocation8] sm:$0x1] %vm1348_vm2, %v833_v55  ;;  %v2446_v56 = vpop.f32.mrb[9].mxu0  ;;  %v1357_v57 = vrot.slane %v833_v55, %v2834_v38  ;;  %v1378_v59 = vcombine.high %v833_v55, %v833_v55 }
 0x31f   :  { %v2189_v58 = vpop.permute.xlu1 %2188 }
 0x320   :  { %2191 = vst.msk [vmem:[#allocation9 + $0x3] sm:$0x1] %vm1396_vm7, %v2189_v58  ;;  %v2306_v60 = vrot.slane %v1357_v57, 9  ;;  %v1385_v6 = vrot.slane %v1378_v59, %v2834_v38  ;;  %v1365_v12 = vcombine.high %v1357_v57, %v1357_v57 }
 0x321   :  { %v2135_v61 = vpop.permute.xlu0 %2134  ;;  %v906_v62 = vpop.f32.mrb[8].mxu1 }
 0x322   :  { %v1418_v63 = vrot.slane %v906_v62, %v2834_v38  ;;  %v3053_v1 = vpop.f32.mrb[10].mxu0  ;;  %v2451_v2 = vpop.f32.mrb[9].mxu1  ;;  %1360 = vrot.lane.b32.xlu0 %v2306_v60, %s2659_s28  ;;  %v1444_v0 = vcombine.high %v906_v62, %v906_v62  ;;  %v2308_v15 = vrot.slane %v1385_v6, 9  ;;  %v1398_v30 = vcombine.high %v1385_v6, %v1385_v6 }
 0x323   :  { %1477 = vst.msk [vmem:[#allocation8 + $0x2] sm:$0x1] %vm1348_vm2, %v3053_v1  ;;  %v2194_v4 = vpop.permute.xlu1 %2193  ;;  %v2456_v5 = vpop.f32.mrb[11].mxu0  ;;  %v2307_v32 = vrot.slane %v1365_v12, 9  ;;  %v1485_v35 = vrot.slane %v3053_v1, %v2834_v38  ;;  %v1503_v39 = vcombine.high %v3053_v1, %v3053_v1 }
 0x324   :  { %2196 = vst.msk [vmem:[#allocation9 + $0x3] sm:$0x1] %vm1402_vm8, %v2194_v4  ;;  %1419 = vrot.lane.b32.xlu1 %v1418_v63, %s2664_s2  ;;  %v2310_v7 = vrot.slane %v1418_v63, 9  ;;  %v1431_v16 = vcombine.high %v1418_v63, %v1418_v63  ;;  %v1451_v20 = vrot.slane %v1444_v0, %v2834_v38 }
 0x325   :  { %v2089_v8 = vpop.permute.xlu0 %2088  ;;  %v3061_v9 = vpop.f32.mrb[10].mxu1  ;;  %v2314_v41 = vrot.slane %v1485_v35, 9 }
 0x326   :  { %2091 = vst.msk [vmem:[#allocation9 + $0x1] sm:$0x1] %vm1409_vm9, %v2089_v8  ;;  %v3064_v10 = vpop.f32.mrb[12].mxu0  ;;  %v2461_v11 = vpop.f32.mrb[11].mxu1  ;;  %1426 = vrot.lane.b32.xlu0 %v2310_v7, %s2665_s25  ;;  %v2311_v23 = vrot.slane %v1431_v16, 9  ;;  %v2312_v28 = vrot.slane %v1451_v20, 9  ;;  %v1539_v29 = vrot.slane %v3061_v9, %v2834_v38  ;;  %v1561_v44 = vcombine.high %v3061_v9, %v3061_v9 }
 0x327   :  { %2102 = vst.msk [vmem:[#allocation9 + $0x1] sm:$0x1] %vm1422_vm10, %v3021_v33  ;;  %v2228_v13 = vpop.permute.xlu1 %2227  ;;  %v2466_v14 = vpop.f32.mrb[13].mxu0  ;;  %v2309_v33 = vrot.slane %v1398_v30, 9  ;;  %v1598_v52 = vrot.slane %v3064_v10, %v2834_v38  ;;  %v1616_v58 = vcombine.high %v3064_v10, %v3064_v10 }
 0x328   :  { %1590 = vst.msk [vmem:[#allocation8 + $0x1] sm:$0x1] %vm1348_vm2, %v3064_v10  ;;  %1366 = vrot.lane.b32.xlu1 %v1365_v12, %s2666_s26  ;;  %v2318_v43 = vrot.slane %v1539_v29, 9  ;;  %v1568_v48 = vrot.slane %v1561_v44, %v2834_v38 }
 0x329   :  { %2108 = vst.msk [vmem:[#allocation9 + $0x1] sm:$0x1] %vm1429_vm11, %v2106_v46  ;;  %v2222_v25 = vpop.permute.xlu0 %2221  ;;  %v1550_v46 = vcombine.high %v1539_v29, %v1539_v29  ;;  %v2322_v56 = vrot.slane %v1598_v52, 9  ;;  %v1605_v57 = vcombine.high %v1598_v52, %v1598_v52 }
 0x32a   :  { %2113 = vst.msk [vmem:[#allocation9 + $0x1] sm:$0x1] %vm1435_vm12, %v3025_v34  ;;  %v3076_v17 = vpop.f32.mrb[12].mxu1  ;;  %1393 = vrot.lane.b32.xlu0 %v2308_v15, %s2669_s30  ;;  %v1464_v34 = vcombine.high %v1451_v20, %v1451_v20  ;;  %v1579_v53 = vcombine.high %v1568_v48, %v1568_v48 }
 0x32b   :  { %2119 = vst.msk [vmem:[#allocation9 + $0x1] sm:$0x1] %vm1442_vm13, %v2117_v54  ;;  %v3081_v18 = vpop.f32.mrb[14].mxu0  ;;  %v2471_v19 = vpop.f32.mrb[13].mxu1  ;;  %v2320_v54 = vrot.slane %v1568_v48, 9  ;;  %v1652_v55 = vrot.slane %v3076_v17, %v2834_v38  ;;  %v2323_v62 = vrot.slane %v1605_v57, 9  ;;  %v1674_v2 = vcombine.high %v3076_v17, %v3076_v17 }
 0x32c   :  { %2131 = vst.msk [vmem:[#allocation9 + $0x1] sm:$0x1] %vm1455_vm14, %v3031_v36  ;;  %v2246_v21 = vpop.permute.xlu1 %2245  ;;  %v2476_v22 = vpop.f32.mrb[15].mxu0  ;;  %1386 = vrot.lane.b32.xlu1 %v1385_v6, %s2668_s29  ;;  %v2313_v36 = vrot.slane %v1464_v34, 9  ;;  %v2321_v63 = vrot.slane %v1579_v53, 9  ;;  %v1711_v12 = vrot.slane %v3081_v18, %v2834_v38  ;;  %v1729_v0 = vcombine.high %v3081_v18, %v3081_v18 }
 0x32d   :  { %2137 = vst.msk [vmem:[#allocation9 + $0x1] sm:$0x1] %vm1462_vm15, %v2135_v61  ;;  %v2240_v31 = vpop.permute.xlu0 %2239  ;;  %v2326_v59 = vrot.slane %v1652_v55, 9  ;;  %v1623_v61 = vrot.slane %v1616_v58, %v2834_v38  ;;  %v1663_v1 = vcombine.high %v1652_v55, %v1652_v55  ;;  %v1681_v5 = vrot.slane %v1674_v2, %v2834_v38 }
 0x32e   :  { %1703 = vst.msk [vmem:[#allocation8 + $0x3] sm:$0x1] %vm1348_vm2, %v3081_v18  ;;  %v3090_v24 = vpop.f32.mrb[14].mxu1  ;;  %1439 = vrot.lane.b32.xlu0 %v2311_v23, %s2671_s6  ;;  %v1718_v14 = vcombine.high %v1711_v12, %v1711_v12  ;;  %v2330_v15 = vrot.slane %v1711_v12, 9 }
 0x32f   :  { %2142 = vst.msk [vmem:[#allocation9 + $0x1] sm:$0x1] %vm1468_vm0, %v3037_v42  ;;  %v2481_v26 = vpop.f32.mrb[15].mxu1  ;;  %v1510_v42 = vrot.slane %v1503_v39, %v2834_v38  ;;  %v2324_v4 = vrot.slane %v1623_v61, 9  ;;  %v2327_v6 = vrot.slane %v1663_v1, 9  ;;  %v2328_v7 = vrot.slane %v1681_v5, 9 }
 0x330   :  { %v2200_v27 = vpop.permute.xlu1 %2199  ;;  %1432 = vrot.lane.b32.xlu1 %v1431_v16, %s2670_s5  ;;  %v1765_v8 = vrot.slane %v3090_v24, %v2834_v38  ;;  %v1634_v9 = vcombine.high %v1623_v61, %v1623_v61  ;;  %v1692_v10 = vcombine.high %v1681_v5, %v1681_v5  ;;  %v1736_v16 = vrot.slane %v1729_v0, %v2834_v38 }
 0x331   :  { %2202 = vst.msk [vmem:[#allocation9 + $0x3] sm:$0x1] %vm1409_vm9, %v2200_v27  ;;  %v2316_v49 = vrot.slane %v1510_v42, 9  ;;  %v1521_v50 = vcombine.high %v1510_v42, %v1510_v42  ;;  %v2331_v18 = vrot.slane %v1718_v14, 9 }
 0x332   :  { %2213 = vst.msk [vmem:[#allocation9 + $0x3] sm:$0x1] %vm1422_vm10, %v3034_v40  ;;  %1459 = vrot.lane.b32.xlu0 %v2312_v28, %s2673_s8  ;;  %v1492_v40 = vcombine.high %v1485_v35, %v1485_v35  ;;  %v2325_v11 = vrot.slane %v1634_v9, 9  ;;  %v2334_v17 = vrot.slane %v1765_v8, 9  ;;  %v1776_v19 = vcombine.high %v1765_v8, %v1765_v8 }
 0x333   :  { %2219 = vst.msk [vmem:[#allocation9 + $0x3] sm:$0x1] %vm1429_vm11, %v3044_v51  ;;  %v2319_v51 = vrot.slane %v1550_v46, 9  ;;  %v2317_v60 = vrot.slane %v1521_v50, 9  ;;  %v2332_v22 = vrot.slane %v1736_v16, 9  ;;  %v1747_v23 = vcombine.high %v1736_v16, %v1736_v16 }
 0x334   :  { %2224 = vst.msk [vmem:[#allocation9 + $0x3] sm:$0x1] %vm1435_vm12, %v2222_v25  ;;  %1452 = vrot.lane.b32.xlu1 %v1451_v20, %s2672_s7  ;;  %v2315_v47 = vrot.slane %v1492_v40, 9  ;;  %v1787_v20 = vcombine.high %v3090_v24, %v3090_v24  ;;  %v2353_v25 = vrot.slane %v2946_v37, 9  ;;  %v2249_v24 = vcombine.high %v2989_v3, %v2989_v3 }
 0x335   :  { %2230 = vst.msk [vmem:[#allocation9 + $0x3] sm:$0x1] %vm1442_vm13, %v2228_v13  ;;  %v2329_v13 = vrot.slane %v1692_v10, 9  ;;  %v2333_v3 = vrot.slane %v1747_v23, 9 }
 0x336   :  { %2242 = vst.msk [vmem:[#allocation9 + $0x3] sm:$0x1] %vm1455_vm14, %v2240_v31  ;;  %1540 = vrot.lane.b32.xlu0 %v1539_v29, %s2664_s2  ;;  %v2361_v29 = vrot.slane %v2961_v45, 9  ;;  %v2369_v39 = vrot.slane %v2249_v24, 9 }
 0x337   :  { %2248 = vst.msk [vmem:[#allocation9 + $0x3] sm:$0x1] %vm1462_vm15, %v2246_v21  ;;  %v1794_v21 = vrot.slane %v1787_v20, %v2834_v38  ;;  %v2335_v38 = vrot.slane %v1776_v19, 9 }
 0x338   :  { %1373 = vrot.lane.b32.xlu1 %v2307_v32, %s2667_s27 }
 0x339   :  { %v1805_v27 = vcombine.high %v1794_v21, %v1794_v21  ;;  %v2336_v37 = vrot.slane %v1794_v21, 9 }
 0x33a   :  { %1406 = vrot.lane.b32.xlu0 %v2309_v33, %s2676_s11 }
 0x33c   :  { %1399 = vrot.lane.b32.xlu1 %v1398_v30, %s2674_s9 }
 0x33e   :  { %1472 = vrot.lane.b32.xlu0 %v2313_v36, %s2677_s12 }
 0x340   :  { %1465 = vrot.lane.b32.xlu1 %v1464_v34, %s2675_s10  ;;  %v2337_v34 = vrot.slane %v1805_v27, 9 }
 0x342   :  { %1493 = vrot.lane.b32.xlu0 %v1492_v40, %s2666_s26 }
 0x344   :  { %1488 = vrot.lane.b32.xlu1 %v2314_v41, %s2659_s28 }
 0x346   :  { %1511 = vrot.lane.b32.xlu0 %v1510_v42, %s2668_s29 }
 0x348   :  { %1546 = vrot.lane.b32.xlu1 %v2318_v43, %s2665_s25 }
 0x34a   :  { %1551 = vrot.lane.b32.xlu0 %v1550_v46, %s2670_s5 }
 0x34c   :  { %1499 = vrot.lane.b32.xlu1 %v2315_v47, %s2667_s27 }
 0x34e   :  { %1569 = vrot.lane.b32.xlu0 %v1568_v48, %s2672_s7 }
 0x350   :  { %1517 = vrot.lane.b32.xlu1 %v2316_v49, %s2669_s30 }
 0x352   :  { %1522 = vrot.lane.b32.xlu0 %v1521_v50, %s2674_s9 }
 0x354   :  { %1557 = vrot.lane.b32.xlu1 %v2319_v51, %s2671_s6 }
 0x356   :  { %1580 = vrot.lane.b32.xlu0 %v1579_v53, %s2675_s10 }
 0x358   :  { %1575 = vrot.lane.b32.xlu1 %v2320_v54, %s2673_s8 }
 0x35a   :  { %1601 = vrot.lane.b32.xlu0 %v2322_v56, %s2659_s28 }
 0x35c   :  { %1653 = vrot.lane.b32.xlu1 %v1652_v55, %s2664_s2 }
 0x35e   :  { %1659 = vrot.lane.b32.xlu0 %v2326_v59, %s2665_s25 }
 0x360   :  { %1528 = vrot.lane.b32.xlu1 %v2317_v60, %s2676_s11 }
 0x362   :  { %1612 = vrot.lane.b32.xlu0 %v2323_v62, %s2667_s27 }
 0x364   :  { %1586 = vrot.lane.b32.xlu1 %v2321_v63, %s2677_s12 }
 0x366   :  { %1630 = vrot.lane.b32.xlu0 %v2324_v4, %s2669_s30 }
 0x368   :  { %1606 = vrot.lane.b32.xlu1 %v1605_v57, %s2666_s26 }
 0x36a   :  { %1670 = vrot.lane.b32.xlu0 %v2327_v6, %s2671_s6 }
 0x36c   :  { %1624 = vrot.lane.b32.xlu1 %v1623_v61, %s2668_s29 }
 0x36e   :  { %1688 = vrot.lane.b32.xlu0 %v2328_v7, %s2673_s8 }
 0x370   :  { %1664 = vrot.lane.b32.xlu1 %v1663_v1, %s2670_s5 }
 0x372   :  { %1766 = vrot.lane.b32.xlu0 %v1765_v8, %s2664_s2 }
 0x374   :  { %1682 = vrot.lane.b32.xlu1 %v1681_v5, %s2672_s7 }
 0x376   :  { %1641 = vrot.lane.b32.xlu0 %v2325_v11, %s2676_s11 }
 0x378   :  { %1635 = vrot.lane.b32.xlu1 %v1634_v9, %s2674_s9 }
 0x37a   :  { %1699 = vrot.lane.b32.xlu0 %v2329_v13, %s2677_s12 }
 0x37c   :  { %1693 = vrot.lane.b32.xlu1 %v1692_v10, %s2675_s10 }
 0x37e   :  { %1719 = vrot.lane.b32.xlu0 %v1718_v14, %s2666_s26 }
 0x380   :  { %1714 = vrot.lane.b32.xlu1 %v2330_v15, %s2659_s28  ;;  %s2678_s28 = smov [#allocation8]  }
 0x381   :  { %s2266_s1 = sshll.u32 %s2678_s28, 4  ;;  %s2267_s1 = int_to_ptr.vmem [resolvable:$true] %s2266_s1 }
 0x382   :  { %1737 = vrot.lane.b32.xlu0 %v1736_v16, %s2668_s29  ;;  %s2604_s15 = scalar_lea.vmem %s2267_s1, 64  ;;  %p2609_p11 = scmp.lt.s32.totalorder %s2267_s1, %s2267_s1 }
 0x383   :  { %p2605_p10 = scmp.ne.s32.totalorder %s2267_s1, %s2604_s15  ;;  %p2610_p12 = scmp.lt.s32.totalorder %s2604_s15, %s2604_s15 }
 0x384   :  { %1772 = vrot.lane.b32.xlu1 %v2334_v17, %s2665_s25 }
 0x385   :  { %p2611_p13 = por %p2610_p12, %p2609_p11 }
 0x386   :  { %1777 = vrot.lane.b32.xlu0 %v1776_v19, %s2670_s5 }
 0x387   :  { %p2612_p0 = pnand %p2611_p13, %p2605_p10 }
 0x388   :  { %1725 = vrot.lane.b32.xlu1 %v2331_v18, %s2667_s27 }
 0x38a   :  { %1795 = vrot.lane.b32.xlu0 %v1794_v21, %s2672_s7 }
 0x38c   :  { %1743 = vrot.lane.b32.xlu1 %v2332_v22, %s2669_s30 }
 0x38e   :  { %1748 = vrot.lane.b32.xlu0 %v1747_v23, %s2674_s9 }
 0x390   :  { %2034 = vrot.lane.b32.xlu1 %v2353_v25, %s2677_s12 }
 0x392   :  { %2250 = vrot.lane.b32.xlu0 %v2249_v24, %s2675_s10 }
 0x394   :  { %v1361_v26 = vpop.permute.xlu0 %1360  ;;  %1783 = vrot.lane.b32.xlu1 %v2335_v38, %s2671_s6 }
 0x395   :  { %1364 = vst.msk [vmem:[#allocation8] sm:$0x1] %vm1363_vm3, %v1361_v26 }
 0x396   :  { %v1420_v28 = vpop.permute.xlu1 %1419  ;;  %1806 = vrot.lane.b32.xlu0 %v1805_v27, %s2675_s10 }
 0x398   :  { %v1427_v30 = vpop.permute.xlu0 %1426  ;;  %1801 = vrot.lane.b32.xlu1 %v2336_v37, %s2673_s8 }
 0x39a   :  { %v1367_v31 = vpop.permute.xlu1 %1366  ;;  %2145 = vrot.lane.b32.xlu0 %v2361_v29, %s2677_s12 }
 0x39b   :  { %1370 = vst.msk [vmem:[#allocation8] sm:$0x1] %vm1369_vm4, %v1367_v31 }
 0x39c   :  { %v1394_v32 = vpop.permute.xlu0 %1393  ;;  %1754 = vrot.lane.b32.xlu1 %v2333_v3, %s2676_s11 }
 0x39e   :  { %v1387_v33 = vpop.permute.xlu1 %1386 }
 0x3a0   :  { %v1440_v35 = vpop.permute.xlu0 %1439  ;;  %1812 = vrot.lane.b32.xlu1 %v2337_v34, %s2677_s12 }
 0x3a2   :  { %v1433_v36 = vpop.permute.xlu1 %1432 }
 0x3a4   :  { %v1460_v45 = vpop.permute.xlu0 %1459  ;;  %2256 = vrot.lane.b32.xlu1 %v2369_v39, %s2677_s12 }
 0x3a6   :  { %v1453_v40 = vpop.permute.xlu1 %1452 }
 0x3a8   :  { %v1541_v41 = vpop.permute.xlu0 %1540 }
 0x3aa   :  { %v1374_v42 = vpop.permute.xlu1 %1373 }
 0x3ab   :  { %1377 = vst.msk [vmem:[#allocation8] sm:$0x1] %vm1376_vm5, %v1374_v42 }
 0x3ac   :  { %1390 = vst.msk [vmem:[#allocation8] sm:$0x1] %vm1389_vm6, %v1387_v33  ;;  %v1407_v43 = vpop.permute.xlu0 %1406 }
 0x3ad   :  { %1397 = vst.msk [vmem:[#allocation8] sm:$0x1] %vm1396_vm7, %v1394_v32 }
 0x3ae   :  { %v1400_v44 = vpop.permute.xlu1 %1399 }
 0x3af   :  { %1403 = vst.msk [vmem:[#allocation8] sm:$0x1] %vm1402_vm8, %v1400_v44 }
 0x3b0   :  { %1410 = vst.msk [vmem:[#allocation8] sm:$0x1] %vm1409_vm9, %v1407_v43  ;;  %v1473_v46 = vpop.permute.xlu0 %1472 }
 0x3b1   :  { %1423 = vst.msk [vmem:[#allocation8] sm:$0x1] %vm1422_vm10, %v1420_v28 }
 0x3b2   :  { %1430 = vst.msk [vmem:[#allocation8] sm:$0x1] %vm1429_vm11, %v1427_v30  ;;  %v1466_v47 = vpop.permute.xlu1 %1465 }
 0x3b3   :  { %1436 = vst.msk [vmem:[#allocation8] sm:$0x1] %vm1435_vm12, %v1433_v36 }
 0x3b4   :  { %1443 = vst.msk [vmem:[#allocation8] sm:$0x1] %vm1442_vm13, %v1440_v35  ;;  %v1494_v48 = vpop.permute.xlu0 %1493 }
 0x3b5   :  { %1456 = vst.msk [vmem:[#allocation8] sm:$0x1] %vm1455_vm14, %v1453_v40 }
 0x3b6   :  { %1463 = vst.msk [vmem:[#allocation8] sm:$0x1] %vm1462_vm15, %v1460_v45  ;;  %v1489_v49 = vpop.permute.xlu1 %1488 }
 0x3b7   :  { %1469 = vst.msk [vmem:[#allocation8] sm:$0x1] %vm1468_vm0, %v1466_v47 }
 0x3b8   :  { %1491 = vst.msk [vmem:[#allocation8 + $0x2] sm:$0x1] %vm1363_vm3, %v1489_v49  ;;  %v1512_v50 = vpop.permute.xlu0 %1511 }
 0x3b9   :  { %1476 = vst.msk [vmem:[#allocation8] sm:$0x1] %vm1475_vm1, %v1473_v46 }
 0x3ba   :  { %1496 = vst.msk [vmem:[#allocation8 + $0x2] sm:$0x1] %vm1369_vm4, %v1494_v48  ;;  %v1547_v51 = vpop.permute.xlu1 %1546 }
 0x3bc   :  { %v1552_v52 = vpop.permute.xlu0 %1551 }
 0x3be   :  { %v1500_v53 = vpop.permute.xlu1 %1499 }
 0x3bf   :  { %1502 = vst.msk [vmem:[#allocation8 + $0x2] sm:$0x1] %vm1376_vm5, %v1500_v53 }
 0x3c0   :  { %1514 = vst.msk [vmem:[#allocation8 + $0x2] sm:$0x1] %vm1389_vm6, %v1512_v50  ;;  %v1570_v54 = vpop.permute.xlu0 %1569 }
 0x3c2   :  { %v1518_v55 = vpop.permute.xlu1 %1517 }
 0x3c3   :  { %1520 = vst.msk [vmem:[#allocation8 + $0x2] sm:$0x1] %vm1396_vm7, %v1518_v55 }
 0x3c4   :  { %v1523_v56 = vpop.permute.xlu0 %1522 }
 0x3c5   :  { %1525 = vst.msk [vmem:[#allocation8 + $0x2] sm:$0x1] %vm1402_vm8, %v1523_v56 }
 0x3c6   :  { %v1558_v57 = vpop.permute.xlu1 %1557 }
 0x3c8   :  { %v1581_v58 = vpop.permute.xlu0 %1580 }
 0x3ca   :  { %v1576_v59 = vpop.permute.xlu1 %1575 }
 0x3cc   :  { %v1602_v60 = vpop.permute.xlu0 %1601 }
 0x3cd   :  { %1604 = vst.msk [vmem:[#allocation8 + $0x1] sm:$0x1] %vm1363_vm3, %v1602_v60 }
 0x3ce   :  { %v1654_v61 = vpop.permute.xlu1 %1653 }
 0x3d0   :  { %v1660_v62 = vpop.permute.xlu0 %1659 }
 0x3d2   :  { %v1529_v63 = vpop.permute.xlu1 %1528 }
 0x3d3   :  { %1531 = vst.msk [vmem:[#allocation8 + $0x2] sm:$0x1] %vm1409_vm9, %v1529_v63 }
 0x3d4   :  { %1543 = vst.msk [vmem:[#allocation8 + $0x2] sm:$0x1] %vm1422_vm10, %v1541_v41  ;;  %v1613_v1 = vpop.permute.xlu0 %1612 }
 0x3d5   :  { %1549 = vst.msk [vmem:[#allocation8 + $0x2] sm:$0x1] %vm1429_vm11, %v1547_v51 }
 0x3d6   :  { %1554 = vst.msk [vmem:[#allocation8 + $0x2] sm:$0x1] %vm1435_vm12, %v1552_v52  ;;  %v1587_v2 = vpop.permute.xlu1 %1586 }
 0x3d7   :  { %1560 = vst.msk [vmem:[#allocation8 + $0x2] sm:$0x1] %vm1442_vm13, %v1558_v57 }
 0x3d8   :  { %1572 = vst.msk [vmem:[#allocation8 + $0x2] sm:$0x1] %vm1455_vm14, %v1570_v54  ;;  %v1631_v4 = vpop.permute.xlu0 %1630 }
 0x3d9   :  { %1578 = vst.msk [vmem:[#allocation8 + $0x2] sm:$0x1] %vm1462_vm15, %v1576_v59 }
 0x3da   :  { %1583 = vst.msk [vmem:[#allocation8 + $0x2] sm:$0x1] %vm1468_vm0, %v1581_v58  ;;  %v1607_v5 = vpop.permute.xlu1 %1606 }
 0x3db   :  { %1589 = vst.msk [vmem:[#allocation8 + $0x2] sm:$0x1] %vm1475_vm1, %v1587_v2 }
 0x3dc   :  { %1609 = vst.msk [vmem:[#allocation8 + $0x1] sm:$0x1] %vm1369_vm4, %v1607_v5  ;;  %v1671_v6 = vpop.permute.xlu0 %1670 }
 0x3dd   :  { %1615 = vst.msk [vmem:[#allocation8 + $0x1] sm:$0x1] %vm1376_vm5, %v1613_v1 }
 0x3de   :  { %v1625_v7 = vpop.permute.xlu1 %1624 }
 0x3df   :  { %1627 = vst.msk [vmem:[#allocation8 + $0x1] sm:$0x1] %vm1389_vm6, %v1625_v7 }
 0x3e0   :  { %1633 = vst.msk [vmem:[#allocation8 + $0x1] sm:$0x1] %vm1396_vm7, %v1631_v4  ;;  %v1689_v8 = vpop.permute.xlu0 %1688 }
 0x3e2   :  { %v1665_v9 = vpop.permute.xlu1 %1664 }
 0x3e4   :  { %v1767_v10 = vpop.permute.xlu0 %1766 }
 0x3e6   :  { %v1683_v11 = vpop.permute.xlu1 %1682 }
 0x3e8   :  { %v1642_v12 = vpop.permute.xlu0 %1641 }
 0x3ea   :  { %v1636_v13 = vpop.permute.xlu1 %1635 }
 0x3eb   :  { %1638 = vst.msk [vmem:[#allocation8 + $0x1] sm:$0x1] %vm1402_vm8, %v1636_v13 }
 0x3ec   :  { %1644 = vst.msk [vmem:[#allocation8 + $0x1] sm:$0x1] %vm1409_vm9, %v1642_v12  ;;  %v1700_v14 = vpop.permute.xlu0 %1699 }
 0x3ed   :  { %1656 = vst.msk [vmem:[#allocation8 + $0x1] sm:$0x1] %vm1422_vm10, %v1654_v61 }
 0x3ee   :  { %1662 = vst.msk [vmem:[#allocation8 + $0x1] sm:$0x1] %vm1429_vm11, %v1660_v62  ;;  %v1694_v0 = vpop.permute.xlu1 %1693 }
 0x3ef   :  { %1667 = vst.msk [vmem:[#allocation8 + $0x1] sm:$0x1] %vm1435_vm12, %v1665_v9 }
 0x3f0   :  { %1673 = vst.msk [vmem:[#allocation8 + $0x1] sm:$0x1] %vm1442_vm13, %v1671_v6  ;;  %v1720_v15 = vpop.permute.xlu0 %1719 }
 0x3f1   :  { %1685 = vst.msk [vmem:[#allocation8 + $0x1] sm:$0x1] %vm1455_vm14, %v1683_v11 }
 0x3f2   :  { %1691 = vst.msk [vmem:[#allocation8 + $0x1] sm:$0x1] %vm1462_vm15, %v1689_v8  ;;  %v1715_v16 = vpop.permute.xlu1 %1714 }
 0x3f3   :  { %1696 = vst.msk [vmem:[#allocation8 + $0x1] sm:$0x1] %vm1468_vm0, %v1694_v0 }
 0x3f4   :  { %1717 = vst.msk [vmem:[#allocation8 + $0x3] sm:$0x1] %vm1363_vm3, %v1715_v16  ;;  %v1738_v17 = vpop.permute.xlu0 %1737 }
 0x3f5   :  { %1702 = vst.msk [vmem:[#allocation8 + $0x1] sm:$0x1] %vm1475_vm1, %v1700_v14 }
 0x3f6   :  { %1722 = vst.msk [vmem:[#allocation8 + $0x3] sm:$0x1] %vm1369_vm4, %v1720_v15  ;;  %v1773_v19 = vpop.permute.xlu1 %1772 }
 0x3f8   :  { %v1778_v20 = vpop.permute.xlu0 %1777 }
 0x3fa   :  { %v1726_v18 = vpop.permute.xlu1 %1725 }
 0x3fb   :  { %1728 = vst.msk [vmem:[#allocation8 + $0x3] sm:$0x1] %vm1376_vm5, %v1726_v18 }
 0x3fc   :  { %1740 = vst.msk [vmem:[#allocation8 + $0x3] sm:$0x1] %vm1389_vm6, %v1738_v17  ;;  %v1796_v21 = vpop.permute.xlu0 %1795 }
 0x3fe   :  { %v1744_v22 = vpop.permute.xlu1 %1743 }
 0x3ff   :  { %1746 = vst.msk [vmem:[#allocation8 + $0x3] sm:$0x1] %vm1396_vm7, %v1744_v22 }
 0x400   :  { %v1749_v23 = vpop.permute.xlu0 %1748 }
 0x401   :  { %1751 = vst.msk [vmem:[#allocation8 + $0x3] sm:$0x1] %vm1402_vm8, %v1749_v23 }
 0x402   :  { %v2035_v25 = vpop.permute.xlu1 %2034 }
 0x403   :  { %2037 = vst.msk [vmem:[#allocation9 + $0x2] sm:$0x1] %vm1475_vm1, %v2035_v25 }
 0x404   :  { %v2251_v24 = vpop.permute.xlu0 %2250 }
 0x405   :  { %2253 = vst.msk [vmem:[#allocation9 + $0x3] sm:$0x1] %vm1468_vm0, %v2251_v24 }
 0x406   :  { %v1784_v38 = vpop.permute.xlu1 %1783 }
 0x408   :  { %v1807_v26 = vpop.permute.xlu0 %1806 }
 0x40a   :  { %v1802_v27 = vpop.permute.xlu1 %1801 }
 0x40c   :  { %v2146_v28 = vpop.permute.xlu0 %2145 }
 0x40d   :  { %2148 = vst.msk [vmem:[#allocation9 + $0x1] sm:$0x1] %vm1475_vm1, %v2146_v28 }
 0x40e   :  { %v1755_v37 = vpop.permute.xlu1 %1754 }
 0x40f   :  { %1757 = vst.msk [vmem:[#allocation8 + $0x3] sm:$0x1] %vm1409_vm9, %v1755_v37 }
 0x410   :  { %1769 = vst.msk [vmem:[#allocation8 + $0x3] sm:$0x1] %vm1422_vm10, %v1767_v10 }
 0x411   :  { %1775 = vst.msk [vmem:[#allocation8 + $0x3] sm:$0x1] %vm1429_vm11, %v1773_v19 }
 0x412   :  { %1780 = vst.msk [vmem:[#allocation8 + $0x3] sm:$0x1] %vm1435_vm12, %v1778_v20  ;;  %v1813_v29 = vpop.permute.xlu1 %1812 }
 0x413   :  { %1786 = vst.msk [vmem:[#allocation8 + $0x3] sm:$0x1] %vm1442_vm13, %v1784_v38 }
 0x414   :  { %1798 = vst.msk [vmem:[#allocation8 + $0x3] sm:$0x1] %vm1455_vm14, %v1796_v21 }
 0x415   :  { %1804 = vst.msk [vmem:[#allocation8 + $0x3] sm:$0x1] %vm1462_vm15, %v1802_v27 }
 0x416   :  { %1809 = vst.msk [vmem:[#allocation8 + $0x3] sm:$0x1] %vm1468_vm0, %v1807_v26  ;;  %v2257_v30 = vpop.permute.xlu1 %2256 }
 0x417   :  { %1815 = vst.msk [vmem:[#allocation8 + $0x3] sm:$0x1] %vm1475_vm1, %v1813_v29  ;;  %2259 = vst.msk [vmem:[#allocation9 + $0x3] sm:$0x1] %vm1475_vm1, %v2257_v30 }
 0x418   :  { %2615 = shalt.err (!%p2612_p0)
}
 0x419   :  { %s2616_s19 = scalar_lea.hbm %s3284_s3, 64 }
 0x41a   :  { %p2617_p1 = scmp.ne.s32.totalorder %s3284_s3, %s2616_s19  ;;  %p2620_p2 = scmp.lt.u32.totalorder %s2616_s19, %s3284_s3 }
 0x41c   :  { %p2622_p3 = pnand %p2620_p2, %p2617_p1 }
 0x41e   :  { %2625 = shalt.err (!%p2622_p3)
}
 0x41f   :  { %2269 = dma.vmem_to_hbm [thread:$0]  %s2267_s1, 64, %s3284_s3, [#allocation4]  }
 0x420   :  { %s2626_s18 = scalar_lea.vmem %s2277_s14, 64  ;;  %p2631_p5 = scmp.lt.s32.totalorder %s2277_s14, %s2277_s14 }
 0x421   :  { %p2627_p4 = scmp.ne.s32.totalorder %s2277_s14, %s2626_s18  ;;  %p2632_p6 = scmp.lt.s32.totalorder %s2626_s18, %s2626_s18 }
 0x423   :  { %p2633_p7 = por %p2632_p6, %p2631_p5 }
 0x425   :  { %p2634_p8 = pnand %p2633_p7, %p2627_p4 }
 0x427   :  { %2637 = shalt.err (!%p2634_p8)
}
 0x428   :  { %s2638_s26 = scalar_lea.hbm %s3285_s4, 64 }
 0x429   :  { %p2639_p9 = scmp.ne.s32.totalorder %s3285_s4, %s2638_s26  ;;  %p2642_p10 = scmp.lt.u32.totalorder %s2638_s26, %s3285_s4 }
 0x42b   :  { %p2644_p11 = pnand %p2642_p10, %p2639_p9 }
 0x42d   :  { %2647 = shalt.err (!%p2644_p11)
}
 0x42e   :  { %2279 = dma.vmem_to_hbm [thread:$0]  %s2277_s14, 64, %s3285_s4, [#allocation10]  }
 0x42f   :  { %2652 = dma.done.wait [#allocation4], 64  }
 0x430   :  { %2653 = vsyncadd [#allocation4], 4294967232 }
 0x431   :  { %2654 = dma.done.wait [#allocation10], 64  }
 0x432   :  { %2655 = vsyncadd [#allocation10], 4294967232 }
 0x433   :  { %2286 = vsyncpa [#allocation3], 1 }
 0x434   :  { %2287 = vsyncpa [#allocation6], 1 }
 0x435   :  { %2288 = vsyncpa [#allocation4], 1 }
 0x436   :  { %2289 = vsyncpa [#allocation10], 1 }

</bundles_post_ra>
